<compile_context>
chip_gen: v7x
topology: tpu7x:2x2x1
jax: 0.10.0
libtpu: 0.0.40
codegen_flags: <defaults>
</compile_context>

<pallas_src>
import functools

import jax
import jax.numpy as jnp
from jax import lax
from jax.experimental import pallas as pl
from jax.experimental.pallas import tpu as pltpu

KH = KW = 7
PAD = 3
EPS = 1e-5
# kh taps contracted in two groups: K = 4*KW*Cin8 (=224) and 3*KW*Cin8 (=168),
# each padding to exactly one 256-deep MXU slab.
_KH_GROUPS = ((0, 4), (4, 7))


def _generator_kernel(x_ref, w_ref, g_ref, b_ref, o_ref, sum_ref, ssq_ref, *,
                      H, W, TH):
    # x_ref : (1, Hp, Wp, Cin8)   bf16  padded NHWC image, resident across row tiles
    # w_ref : (Cout, KH*KW*Cin8)  bf16  conv weights, K order = (kh, kw, c)
    # g_ref : (Cout, 1)           f32   InstanceNorm gamma
    # b_ref : (Cout, 1)           f32   InstanceNorm beta
    # o_ref : (1, Cout, H*W)      staged conv activations; normalized in place
    #                             on the last row tile (resident across tiles)
    # sum_ref, ssq_ref : (Cout,1) f32   running per-image sum / sum-of-squares
    _, Hp, Wp, Cin8 = x_ref.shape
    KWC = KW * Cin8
    THH = TH + KH - 1                       # tile rows incl. 6-row halo
    TP = TH * W                             # output pixels per tile

    t = pl.program_id(1)
    last = pl.num_programs(1) - 1

    @pl.when(t == 0)
    def _init():
        sum_ref[...] = jnp.zeros_like(sum_ref)
        ssq_ref[...] = jnp.zeros_like(ssq_ref)

    # ---- this tile's input rows (output rows [t*TH, t*TH+TH) + halo) ----------
    row0 = t * TH
    if TH % 8 == 0:
        row0 = pl.multiple_of(row0, 8)
    xt = x_ref[0, pl.ds(row0, THH), :, :]                       # (THH, Wp, Cin8)

    # ---- im2col step 1: fold the kw taps onto the lane axis -------------------
    # xw[r, w, kw*Cin8 + c] = xt[r, w + kw, c]
    xw = jnp.concatenate([xt[:, kw:kw + W, :] for kw in range(KW)], axis=-1)

    # ---- im2col step 2 + MXU: one matmul per kh group, f32 accumulation -------
    acc = None
    for lo, hi in _KH_GROUPS:
        pieces = [xw[kh:kh + TH].reshape(TP, KWC) for kh in range(lo, hi)]
        pg = pieces[0] if len(pieces) == 1 else jnp.concatenate(pieces, axis=-1)
        part = lax.dot_general(
            w_ref[:, lo * KWC:hi * KWC], pg,
            dimension_numbers=(((1,), (1,)), ((), ())),
            preferred_element_type=jnp.float32)                 # (Cout, TP)
        acc = part if acc is None else acc + part

    # ---- one-pass InstanceNorm statistics --------------------------------------
    sum_ref[...] += jnp.sum(acc, axis=1, keepdims=True)
    ssq_ref[...] += jnp.sum(acc * acc, axis=1, keepdims=True)

    # ---- stage this tile's (un-normalized) activations in the resident block ---
    pix0 = t * TP
    if TP % 128 == 0:
        pix0 = pl.multiple_of(pix0, 128)
    o_ref[0, :, pl.ds(pix0, TP)] = acc.astype(o_ref.dtype)

    # ---- last tile: finalize stats, normalize + affine + ReLU whole image ------
    @pl.when(t == last)
    def _finalize():
        inv_n = 1.0 / float(H * W)
        mean = sum_ref[...] * inv_n
        var = jnp.maximum(ssq_ref[...] * inv_n - mean * mean, 0.0)
        scale = lax.rsqrt(var + EPS) * g_ref[...]               # (Cout, 1)
        shift = b_ref[...] - mean * scale                       # (Cout, 1)
        y = o_ref[0].astype(jnp.float32) * scale + shift
        o_ref[0] = jnp.maximum(y, 0.0).astype(o_ref.dtype)


def _pick_row_tile(H, W):
    """Largest multiple-of-8 divisor of H giving <= ~4K output pixels per tile."""
    cands = [d for d in range(8, H + 1, 8) if H % d == 0]
    if not cands:
        return H
    target = max(8, 4096 // max(W, 1))
    fits = [d for d in cands if d <= target]
    return max(fits) if fits else min(cands)


def generator_forward(image, domain, weight_hwio, gamma, beta, *,
                      row_tile=None, out_dtype=jnp.bfloat16):
    """image: (N, 3, H, W) NCHW; domain: (N, c_dim); returns (N, conv_dim, H, W)."""
    N, C_img, H, W = image.shape
    c_dim = domain.shape[1]
    Cin = C_img + c_dim
    assert weight_hwio.shape[:3] == (KH, KW, Cin), weight_hwio.shape
    Cout = weight_hwio.shape[-1]
    Cin8 = ((Cin + 7) // 8) * 8                 # pad channels to a sublane multiple
    K = KH * KW * Cin8
    Hp, Wp = H + 2 * PAD, W + 2 * PAD

    TH = _pick_row_tile(H, W) if row_tile is None else int(row_tile)
    assert H % TH == 0 and (TH % 8 == 0 or TH == H), (H, TH)
    n_tiles = H // TH

    # --- plain-JAX glue: broadcast domain, concat, NHWC, spatial+channel pad ----
    # TODO(synk): fold this glue (domain-channel synthesis in particular) into
    # the kernel to save the extra pre-kernel HBM passes.
    dom = jnp.broadcast_to(domain[:, :, None, None], (N, c_dim, H, W)).astype(image.dtype)
    x = jnp.concatenate([image, dom], axis=1)                    # (N, Cin, H, W)
    x = jnp.transpose(x, (0, 2, 3, 1))                           # NHWC
    x = jnp.pad(x, ((0, 0), (PAD, PAD), (PAD, PAD), (0, Cin8 - Cin)))
    x = x.astype(jnp.bfloat16)                                   # bf16 MXU operands

    # Weights: HWIO, pad Cin -> Cin8, flatten to (Cout, KH*KW*Cin8), K = (kh,kw,c).
    w = jnp.pad(weight_hwio, ((0, 0), (0, 0), (0, Cin8 - Cin), (0, 0)))
    w = jnp.transpose(w, (3, 0, 1, 2)).reshape(Cout, K).astype(jnp.bfloat16)
    g = gamma.reshape(Cout, 1).astype(jnp.float32)
    b = beta.reshape(Cout, 1).astype(jnp.float32)

    out_bytes = jnp.dtype(out_dtype).itemsize

    # --- scoped-VMEM budget sized from the actual resident block footprint -----
    def _ceil(a, m):
        return (a + m - 1) // m * m

    in_blk = Hp * _ceil(Wp, 16) * 128 * 2                         # padded bf16 image
    out_blk = _ceil(Cout, 16) * _ceil(H * W, 128) * out_bytes     # staged activations
    w_blk = _ceil(Cout, 16) * _ceil(K, 128) * 2
    patch_blk = 2 * TH * W * _ceil(4 * KW * Cin8, 128) * 2        # both kh-group slabs
    xw_blk = _ceil(TH + KH - 1, 16) * W * _ceil(KW * Cin8, 128) * 2
    acc_blk = _ceil(Cout, 8) * TH * W * 4
    vmem_est = 2 * in_blk + 2 * out_blk + w_blk + patch_blk + xw_blk + acc_blk
    vmem_limit = int(min(100 << 20, max(32 << 20, 2 * vmem_est)))

    cost = pl.CostEstimate(
        flops=2 * N * H * W * KH * KW * Cin * Cout + 10 * N * Cout * H * W,
        transcendentals=0,
        bytes_accessed=int(x.size * 2 + w.size * 2 + N * Cout * H * W * out_bytes))

    kernel = functools.partial(_generator_kernel, H=H, W=W, TH=TH)

    out = pl.pallas_call(
        kernel,
        out_shape=jax.ShapeDtypeStruct((N, Cout, H * W), out_dtype),
        grid_spec=pltpu.PrefetchScalarGridSpec(
            num_scalar_prefetch=0,
            grid=(N, n_tiles),
            in_specs=[
                # padded image: resident per sample across all row tiles
                pl.BlockSpec((1, Hp, Wp, Cin8), lambda n, t: (n, 0, 0, 0)),
                # weights / affine params: resident across the whole grid
                pl.BlockSpec((Cout, K), lambda n, t: (0, 0)),
                pl.BlockSpec((Cout, 1), lambda n, t: (0, 0)),
                pl.BlockSpec((Cout, 1), lambda n, t: (0, 0)),
            ],
            # output block revisited across row tiles; DMAed back once per sample
            out_specs=pl.BlockSpec((1, Cout, H * W), lambda n, t: (n, 0, 0)),
            scratch_shapes=[pltpu.VMEM((Cout, 1), jnp.float32),
                            pltpu.VMEM((Cout, 1), jnp.float32)],
        ),
        compiler_params=pltpu.CompilerParams(
            dimension_semantics=("parallel", "arbitrary"),
            vmem_limit_bytes=vmem_limit),
        cost_estimate=cost,
    )(x, w, g, b)

    # (N, Cout, H*W) is already channel-major: free reshape to NCHW.
    return out.reshape(N, Cout, H, W)


def _reference_forward(image, domain, weight_hwio, gamma, beta):
    """Pure-JAX reference of the same forward pass (for verification)."""
    N, _, H, W = image.shape
    c_dim = domain.shape[1]
    dom = jnp.broadcast_to(domain[:, :, None, None], (N, c_dim, H, W))
    x = jnp.concatenate([image, dom.astype(image.dtype)], axis=1)
    x = jnp.transpose(x, (0, 2, 3, 1))                            # NHWC
    # Match the kernel's bf16 operand quantization (accumulation stays f32).
    x = x.astype(jnp.bfloat16).astype(jnp.float32)
    w = weight_hwio.astype(jnp.bfloat16).astype(jnp.float32)
    y = lax.conv_general_dilated(
        x, w, window_strides=(1, 1), padding=((PAD, PAD), (PAD, PAD)),
        dimension_numbers=("NHWC", "HWIO", "NHWC"),
        precision=lax.Precision.HIGHEST)
    mean = jnp.mean(y, axis=(1, 2), keepdims=True)
    var = jnp.mean((y - mean) ** 2, axis=(1, 2), keepdims=True)
    y = (y - mean) * lax.rsqrt(var + EPS)
    y = y * gamma.reshape(1, 1, 1, -1) + beta.reshape(1, 1, 1, -1)
    y = jnp.maximum(y, 0.0)
    return jnp.transpose(y, (0, 3, 1, 2))


if __name__ == "__main__":
    # Small, deterministic example shapes (row_tile=8 -> 2 row tiles per image,
    # exercising the staged-statistics / in-place finalize path).
    N, C_IMG, H, W = 2, 3, 16, 16
    C_DIM = 4          # domain one-hot size
    CONV_DIM = 8       # output channels of the first conv
    CIN = C_IMG + C_DIM

    key = jax.random.PRNGKey(0)
    k_img, k_dom, k_w = jax.random.split(key, 3)

    image = jax.random.normal(k_img, (N, C_IMG, H, W), dtype=jnp.float32)
    domain = jax.nn.one_hot(
        jax.random.randint(k_dom, (N,), 0, C_DIM), C_DIM, dtype=jnp.float32)

    # Deterministic parameter init (PyTorch defaults: IN gamma=1, beta=0).
    weight_hwio = 0.05 * jax.random.normal(
        k_w, (KH, KW, CIN, CONV_DIM), dtype=jnp.float32)
    gamma = jnp.ones((CONV_DIM,), jnp.float32)
    beta = jnp.zeros((CONV_DIM,), jnp.float32)

    out = generator_forward(image, domain, weight_hwio, gamma, beta, row_tile=8)
    out = jax.block_until_ready(out)

    assert out.shape == (N, CONV_DIM, H, W), out.shape
    assert out.dtype == jnp.bfloat16, out.dtype

    ref = _reference_forward(image, domain, weight_hwio, gamma, beta)
    err = float(jnp.max(jnp.abs(out.astype(jnp.float32) - ref)))
    # Tolerance covers bf16 staging of the conv activations + bf16 output.
    assert err < 6e-2, f"max abs err {err}"

    print("KERNEL_OK")
</pallas_src>

<mosaic_0001>
module attributes {stable_mosaic.version = 11 : i64} {
  func.func @_generator_kernel(%arg0: i32, %arg1: i32, %arg2: memref<1x22x22x8xbf16, #tpu.memory_space<vmem>>, %arg3: memref<8x392xbf16, #tpu.memory_space<vmem>>, %arg4: memref<8x1xf32, #tpu.memory_space<vmem>>, %arg5: memref<8x1xf32, #tpu.memory_space<vmem>>, %arg6: memref<1x8x256xbf16, #tpu.memory_space<vmem>>, %arg7: memref<8x1xf32, #tpu.memory_space<vmem>>, %arg8: memref<8x1xf32, #tpu.memory_space<vmem>>) attributes {dimension_semantics = [#tpu.dimension_semantics<parallel>, #tpu.dimension_semantics<arbitrary>], iteration_bounds = array<i64: 2, 2>, scalar_prefetch = 0 : i64, scratch_operands = 2 : i64, tpu.core_type = #tpu.core_type<tc>, window_params = [{transform_indices = @transform_0, window_bounds = array<i64: 1, 22, 22, 8>}, {pipeline_mode = #tpu.pipeline_mode<synchronous>, transform_indices = @transform_1, window_bounds = array<i64: 8, 392>}, {pipeline_mode = #tpu.pipeline_mode<synchronous>, transform_indices = @transform_2, window_bounds = array<i64: 8, 1>}, {pipeline_mode = #tpu.pipeline_mode<synchronous>, transform_indices = @transform_3, window_bounds = array<i64: 8, 1>}, {transform_indices = @transform_4, window_bounds = array<i64: 1, 8, 256>}]} {
    %c0_i32 = arith.constant 0 : i32
    %0 = arith.cmpi eq, %arg1, %c0_i32 : i32
    %1 = arith.extui %0 : i1 to i32
    %c0_i32_0 = arith.constant 0 : i32
    %2 = arith.cmpi ne, %1, %c0_i32_0 : i32
    scf.if %2 {
      %cst_20 = arith.constant 0.000000e+00 : f32
      %58 = vector.broadcast %cst_20 : f32 to vector<8x1xf32>
      %c0_21 = arith.constant 0 : index
      %c0_22 = arith.constant 0 : index
      %59 = vector.load %arg7[%c0_21, %c0_22] : memref<8x1xf32, #tpu.memory_space<vmem>>, vector<8x1xf32>
      tpu.vector_store %arg7[%c0_21, %c0_22], %58 {strides = array<i32>} : memref<8x1xf32, #tpu.memory_space<vmem>>, vector<8x1xf32>,
      %cst_23 = arith.constant 0.000000e+00 : f32
      %60 = vector.broadcast %cst_23 : f32 to vector<8x1xf32>
      %c0_24 = arith.constant 0 : index
      %c0_25 = arith.constant 0 : index
      %61 = vector.load %arg8[%c0_24, %c0_25] : memref<8x1xf32, #tpu.memory_space<vmem>>, vector<8x1xf32>
      tpu.vector_store %arg8[%c0_24, %c0_25], %60 {strides = array<i32>} : memref<8x1xf32, #tpu.memory_space<vmem>>, vector<8x1xf32>,
    } else {
    }
    %c8_i32 = arith.constant 8 : i32
    %3 = arith.muli %arg1, %c8_i32 : i32
    %4 = tpu.assume_multiple %3, 8 : i32
    %c0 = arith.constant 0 : index
    %5 = arith.index_cast %4 : i32 to index
    %c0_1 = arith.constant 0 : index
    %c0_2 = arith.constant 0 : index
    %6 = vector.load %arg2[%c0, %5, %c0_1, %c0_2] : memref<1x22x22x8xbf16, #tpu.memory_space<vmem>>, vector<1x14x22x8xbf16>
    %7 = vector.shape_cast %6 : vector<1x14x22x8xbf16> to vector<14x22x8xbf16>
    %8 = vector.extract_strided_slice %7 {offsets = [0, 0, 0], sizes = [14, 16, 8], strides = [1, 1, 1]} : vector<14x22x8xbf16> to vector<14x16x8xbf16>
    %9 = vector.extract_strided_slice %7 {offsets = [0, 1, 0], sizes = [14, 16, 8], strides = [1, 1, 1]} : vector<14x22x8xbf16> to vector<14x16x8xbf16>
    %10 = vector.extract_strided_slice %7 {offsets = [0, 2, 0], sizes = [14, 16, 8], strides = [1, 1, 1]} : vector<14x22x8xbf16> to vector<14x16x8xbf16>
    %11 = vector.extract_strided_slice %7 {offsets = [0, 3, 0], sizes = [14, 16, 8], strides = [1, 1, 1]} : vector<14x22x8xbf16> to vector<14x16x8xbf16>
    %12 = vector.extract_strided_slice %7 {offsets = [0, 4, 0], sizes = [14, 16, 8], strides = [1, 1, 1]} : vector<14x22x8xbf16> to vector<14x16x8xbf16>
    %13 = vector.extract_strided_slice %7 {offsets = [0, 5, 0], sizes = [14, 16, 8], strides = [1, 1, 1]} : vector<14x22x8xbf16> to vector<14x16x8xbf16>
    %14 = vector.extract_strided_slice %7 {offsets = [0, 6, 0], sizes = [14, 16, 8], strides = [1, 1, 1]} : vector<14x22x8xbf16> to vector<14x16x8xbf16>
    %15 = tpu.concatenate %8, %9, %10, %11, %12, %13, %14 in 2 : vector<14x16x8xbf16>, vector<14x16x8xbf16>, vector<14x16x8xbf16>, vector<14x16x8xbf16>, vector<14x16x8xbf16>, vector<14x16x8xbf16>, vector<14x16x8xbf16> -> vector<14x16x56xbf16>
    %16 = vector.extract_strided_slice %15 {offsets = [0, 0, 0], sizes = [8, 16, 56], strides = [1, 1, 1]} : vector<14x16x56xbf16> to vector<8x16x56xbf16>
    %17 = vector.shape_cast %16 : vector<8x16x56xbf16> to vector<128x56xbf16>
    %18 = vector.extract_strided_slice %15 {offsets = [1, 0, 0], sizes = [8, 16, 56], strides = [1, 1, 1]} : vector<14x16x56xbf16> to vector<8x16x56xbf16>
    %19 = vector.shape_cast %18 : vector<8x16x56xbf16> to vector<128x56xbf16>
    %20 = vector.extract_strided_slice %15 {offsets = [2, 0, 0], sizes = [8, 16, 56], strides = [1, 1, 1]} : vector<14x16x56xbf16> to vector<8x16x56xbf16>
    %21 = vector.shape_cast %20 : vector<8x16x56xbf16> to vector<128x56xbf16>
    %22 = vector.extract_strided_slice %15 {offsets = [3, 0, 0], sizes = [8, 16, 56], strides = [1, 1, 1]} : vector<14x16x56xbf16> to vector<8x16x56xbf16>
    %23 = vector.shape_cast %22 : vector<8x16x56xbf16> to vector<128x56xbf16>
    %24 = tpu.concatenate %17, %19, %21, %23 in 1 : vector<128x56xbf16>, vector<128x56xbf16>, vector<128x56xbf16>, vector<128x56xbf16> -> vector<128x224xbf16>
    %c0_3 = arith.constant 0 : index
    %c0_4 = arith.constant 0 : index
    %25 = vector.load %arg3[%c0_3, %c0_4] : memref<8x392xbf16, #tpu.memory_space<vmem>>, vector<8x224xbf16>
    %cst = arith.constant dense<0.000000e+00> : vector<8x128xf32>
    %26 = tpu.matmul %25, %24, %cst {dimension_numbers = #tpu.dot_dimension_numbers<[1], [1], [0], [0], [0, 0, 1, 0], [], []>} : vector<8x224xbf16>, vector<128x224xbf16>, vector<8x128xf32> -> vector<8x128xf32>
    %27 = vector.extract_strided_slice %15 {offsets = [4, 0, 0], sizes = [8, 16, 56], strides = [1, 1, 1]} : vector<14x16x56xbf16> to vector<8x16x56xbf16>
    %28 = vector.shape_cast %27 : vector<8x16x56xbf16> to vector<128x56xbf16>
    %29 = vector.extract_strided_slice %15 {offsets = [5, 0, 0], sizes = [8, 16, 56], strides = [1, 1, 1]} : vector<14x16x56xbf16> to vector<8x16x56xbf16>
    %30 = vector.shape_cast %29 : vector<8x16x56xbf16> to vector<128x56xbf16>
    %31 = vector.extract_strided_slice %15 {offsets = [6, 0, 0], sizes = [8, 16, 56], strides = [1, 1, 1]} : vector<14x16x56xbf16> to vector<8x16x56xbf16>
    %32 = vector.shape_cast %31 : vector<8x16x56xbf16> to vector<128x56xbf16>
    %33 = tpu.concatenate %28, %30, %32 in 1 : vector<128x56xbf16>, vector<128x56xbf16>, vector<128x56xbf16> -> vector<128x168xbf16>
    %c0_5 = arith.constant 0 : index
    %c224 = arith.constant 224 : index
    %34 = vector.load %arg3[%c0_5, %c224] : memref<8x392xbf16, #tpu.memory_space<vmem>>, vector<8x168xbf16>
    %cst_6 = arith.constant dense<0.000000e+00> : vector<8x128xf32>
    %35 = tpu.matmul %34, %33, %cst_6 {dimension_numbers = #tpu.dot_dimension_numbers<[1], [1], [0], [0], [0, 0, 1, 0], [], []>} : vector<8x168xbf16>, vector<128x168xbf16>, vector<8x128xf32> -> vector<8x128xf32>
    %36 = arith.addf %26, %35 : vector<8x128xf32>
    %c0_7 = arith.constant 0 : index
    %c0_8 = arith.constant 0 : index
    %37 = vector.load %arg7[%c0_7, %c0_8] : memref<8x1xf32, #tpu.memory_space<vmem>>, vector<8x1xf32>
    %cst_9 = arith.constant dense<0.000000e+00> : vector<8xf32>
    %38 = vector.multi_reduction <add>, %36, %cst_9 [1] : vector<8x128xf32> to vector<8xf32>
    %39 = vector.shape_cast %38 : vector<8xf32> to vector<8x1xf32>
    %40 = arith.addf %37, %39 : vector<8x1xf32>
    %c0_10 = arith.constant 0 : index
    %c0_11 = arith.constant 0 : index
    %41 = vector.load %arg7[%c0_10, %c0_11] : memref<8x1xf32, #tpu.memory_space<vmem>>, vector<8x1xf32>
    tpu.vector_store %arg7[%c0_10, %c0_11], %40 {strides = array<i32>} : memref<8x1xf32, #tpu.memory_space<vmem>>, vector<8x1xf32>,
    %c0_12 = arith.constant 0 : index
    %c0_13 = arith.constant 0 : index
    %42 = vector.load %arg8[%c0_12, %c0_13] : memref<8x1xf32, #tpu.memory_space<vmem>>, vector<8x1xf32>
    %43 = arith.mulf %36, %36 : vector<8x128xf32>
    %cst_14 = arith.constant dense<0.000000e+00> : vector<8xf32>
    %44 = vector.multi_reduction <add>, %43, %cst_14 [1] : vector<8x128xf32> to vector<8xf32>
    %45 = vector.shape_cast %44 : vector<8xf32> to vector<8x1xf32>
    %46 = arith.addf %42, %45 : vector<8x1xf32>
    %c0_15 = arith.constant 0 : index
    %c0_16 = arith.constant 0 : index
    %47 = vector.load %arg8[%c0_15, %c0_16] : memref<8x1xf32, #tpu.memory_space<vmem>>, vector<8x1xf32>
    tpu.vector_store %arg8[%c0_15, %c0_16], %46 {strides = array<i32>} : memref<8x1xf32, #tpu.memory_space<vmem>>, vector<8x1xf32>,
    %c128_i32 = arith.constant 128 : i32
    %48 = arith.muli %arg1, %c128_i32 : i32
    %49 = tpu.assume_multiple %48, 128 : i32
    %50 = arith.truncf %36 : vector<8x128xf32> to vector<8x128xbf16>
    %c0_17 = arith.constant 0 : index
    %c0_18 = arith.constant 0 : index
    %51 = arith.index_cast %49 : i32 to index
    %52 = vector.load %arg6[%c0_17, %c0_18, %51] : memref<1x8x256xbf16, #tpu.memory_space<vmem>>, vector<1x8x128xbf16>
    %53 = vector.shape_cast %52 : vector<1x8x128xbf16> to vector<8x128xbf16>
    %54 = vector.shape_cast %50 : vector<8x128xbf16> to vector<1x8x128xbf16>
    tpu.vector_store %arg6[%c0_17, %c0_18, %51], %54 {strides = array<i32>} : memref<1x8x256xbf16, #tpu.memory_space<vmem>>, vector<1x8x128xbf16>,
    %c1_i32 = arith.constant 1 : i32
    %55 = arith.cmpi eq, %arg1, %c1_i32 : i32
    %56 = arith.extui %55 : i1 to i32
    %c0_i32_19 = arith.constant 0 : i32
    %57 = arith.cmpi ne, %56, %c0_i32_19 : i32
    scf.if %57 {
      %c0_20 = arith.constant 0 : index
      %c0_21 = arith.constant 0 : index
      %58 = vector.load %arg7[%c0_20, %c0_21] : memref<8x1xf32, #tpu.memory_space<vmem>>, vector<8x1xf32>
      %cst_22 = arith.constant 3.906250e-03 : f32
      %59 = vector.broadcast %cst_22 : f32 to vector<8x1xf32>
      %60 = arith.mulf %58, %59 : vector<8x1xf32>
      %c0_23 = arith.constant 0 : index
      %c0_24 = arith.constant 0 : index
      %61 = vector.load %arg8[%c0_23, %c0_24] : memref<8x1xf32, #tpu.memory_space<vmem>>, vector<8x1xf32>
      %cst_25 = arith.constant 3.906250e-03 : f32
      %62 = vector.broadcast %cst_25 : f32 to vector<8x1xf32>
      %63 = arith.mulf %61, %62 : vector<8x1xf32>
      %64 = arith.mulf %60, %60 : vector<8x1xf32>
      %65 = arith.subf %63, %64 : vector<8x1xf32>
      %cst_26 = arith.constant 0.000000e+00 : f32
      %66 = vector.broadcast %cst_26 : f32 to vector<8x1xf32>
      %67 = arith.maximumf %65, %66 : vector<8x1xf32>
      %cst_27 = arith.constant 9.99999974E-6 : f32
      %68 = vector.broadcast %cst_27 : f32 to vector<8x1xf32>
      %69 = arith.addf %67, %68 : vector<8x1xf32>
      %70 = math.rsqrt %69 : vector<8x1xf32>
      %c0_28 = arith.constant 0 : index
      %c0_29 = arith.constant 0 : index
      %71 = vector.load %arg4[%c0_28, %c0_29] : memref<8x1xf32, #tpu.memory_space<vmem>>, vector<8x1xf32>
      %72 = arith.mulf %70, %71 : vector<8x1xf32>
      %c0_30 = arith.constant 0 : index
      %c0_31 = arith.constant 0 : index
      %73 = vector.load %arg5[%c0_30, %c0_31] : memref<8x1xf32, #tpu.memory_space<vmem>>, vector<8x1xf32>
      %74 = arith.mulf %60, %72 : vector<8x1xf32>
      %75 = arith.subf %73, %74 : vector<8x1xf32>
      %c0_32 = arith.constant 0 : index
      %c0_33 = arith.constant 0 : index
      %c0_34 = arith.constant 0 : index
      %76 = vector.load %arg6[%c0_32, %c0_33, %c0_34] : memref<1x8x256xbf16, #tpu.memory_space<vmem>>, vector<1x8x256xbf16>
      %77 = vector.shape_cast %76 : vector<1x8x256xbf16> to vector<8x256xbf16>
      %78 = arith.extf %77 : vector<8x256xbf16> to vector<8x256xf32>
      %79 = vector.broadcast %72 : vector<8x1xf32> to vector<8x256xf32>
      %80 = arith.mulf %78, %79 : vector<8x256xf32>
      %81 = vector.broadcast %75 : vector<8x1xf32> to vector<8x256xf32>
      %82 = arith.addf %80, %81 : vector<8x256xf32>
      %cst_35 = arith.constant 0.000000e+00 : f32
      %83 = vector.broadcast %cst_35 : f32 to vector<8x256xf32>
      %84 = arith.maximumf %82, %83 : vector<8x256xf32>
      %85 = arith.truncf %84 : vector<8x256xf32> to vector<8x256xbf16>
      %c0_36 = arith.constant 0 : index
      %c0_37 = arith.constant 0 : index
      %c0_38 = arith.constant 0 : index
      %86 = vector.load %arg6[%c0_36, %c0_37, %c0_38] : memref<1x8x256xbf16, #tpu.memory_space<vmem>>, vector<1x8x256xbf16>
      %87 = vector.shape_cast %86 : vector<1x8x256xbf16> to vector<8x256xbf16>
      %88 = vector.shape_cast %85 : vector<8x256xbf16> to vector<1x8x256xbf16>
      tpu.vector_store %arg6[%c0_36, %c0_37, %c0_38], %88 {strides = array<i32>} : memref<1x8x256xbf16, #tpu.memory_space<vmem>>, vector<1x8x256xbf16>,
    } else {
    }
    return
  }
  func.func @transform_0(%arg0: i32, %arg1: i32) -> (i32, i32, i32, i32) {
    %c0_i32 = arith.constant 0 : i32
    %c0_i32_0 = arith.constant 0 : i32
    %c0_i32_1 = arith.constant 0 : i32
    %c0_i32_2 = arith.constant 0 : i32
    return %arg0, %c0_i32, %c0_i32_0, %c0_i32_1 : i32, i32, i32, i32
  }
  func.func @transform_1(%arg0: i32, %arg1: i32) -> (i32, i32) {
    %c0_i32 = arith.constant 0 : i32
    %c0_i32_0 = arith.constant 0 : i32
    %c0_i32_1 = arith.constant 0 : i32
    return %c0_i32, %c0_i32_0 : i32, i32
  }
  func.func @transform_2(%arg0: i32, %arg1: i32) -> (i32, i32) {
    %c0_i32 = arith.constant 0 : i32
    %c0_i32_0 = arith.constant 0 : i32
    %c0_i32_1 = arith.constant 0 : i32
    return %c0_i32, %c0_i32_0 : i32, i32
  }
  func.func @transform_3(%arg0: i32, %arg1: i32) -> (i32, i32) {
    %c0_i32 = arith.constant 0 : i32
    %c0_i32_0 = arith.constant 0 : i32
    %c0_i32_1 = arith.constant 0 : i32
    return %c0_i32, %c0_i32_0 : i32, i32
  }
  func.func @transform_4(%arg0: i32, %arg1: i32) -> (i32, i32, i32) {
    %c0_i32 = arith.constant 0 : i32
    %c0_i32_0 = arith.constant 0 : i32
    %c0_i32_1 = arith.constant 0 : i32
    return %arg0, %c0_i32, %c0_i32_0 : i32, i32, i32
  }
}

</mosaic_0001>

<bundles_post_ra>
// kernel: tpu_custom_call.1
= control target key start
LH: loop header
LB: loop body
LE: loop exit
PB: predicated region body
PF: predicated region fallthrough
CT: control target
= control target key end

     0   :  { %9 = vsyncpa [#allocation5], 0  ;;  %s3008_s0 = inlined_call_operand.vmem [shape: bf16[2,22,22,8], index: 0, kind: input, shape index: {}]   ;;  %s3009_s1 = inlined_call_operand.vmem [shape: bf16[8,392], index: 1, kind: input, shape index: {}]   ;;  %s3010_s2 = inlined_call_operand.vmem [shape: f32[8,1], index: 2, kind: input, shape index: {}]   ;;  %s3011_s3 = inlined_call_operand.vmem [shape: f32[8,1], index: 3, kind: input, shape index: {}]   ;;  %s3012_s4 = inlined_call_operand.hbm [shape: bf16[2,8,256], index: 4, kind: output, shape index: {}]  }
   0x1   :  { %11 = vsyncpa [#allocation5 + $0x1], 0  ;;  %s2025_s15 = smov 0   ;;  %s2027_s16 = smov 0  }
   0x2   :  { %s2029_s17 = smov 0   ;;  %s2031_s18 = smov 0  }
   0x3   :  { %s2033_s19 = smov 0   ;;  %s2035_s20 = smov 0  }
   0x4   :  { %s2037_s21 = smov 0   ;;  %s2039_s22 = smov 0  }
   0x5 LB: > { %s1695_s23 = sadd.s32 4294967295, %s1987_s22   ;;  %s1696_s24 = sadd.s32 4294967294, %s1987_s22   ;;  %s1987_s22 = sphi %s2039_s22, %s17_s22   ;;  %s1983_s21 = sphi %s2037_s21, %s3021_s21   ;;  %s1979_s20 = sphi %s2035_s20, %s3020_s20   ;;  %s1975_s19 = sphi %s2033_s19, %s3019_s19   ;;  %s1971_s18 = sphi %s2031_s18, %s3018_s18   ;;  %s1967_s17 = sphi %s2029_s17, %s3017_s17   ;;  %s1963_s16 = sphi %s2027_s16, %s3016_s16   ;;  %s1959_s15 = sphi %s2025_s15, %s3015_s15  }
   0x6   : > { %s26_s25 = sadd.s32 1, %s1979_s20  ;;  %s29_s26 = sadd.s32 1, %s1983_s21 }
   0x7   : > { %p27_p0 = scmp.ge.s32.totalorder %s26_s25, 2  ;;  %p135_p1 = scmp.ne.s32.totalorder %s1967_s17, %s1963_s16 }
   0x8   : > { %p136_p2 = scmp.eq.s32.totalorder %s1695_s23, 3  ;;  %p141_p4 = scmp.ne.s32.totalorder %s1963_s16, %s1959_s15 }
   0x9   : > { %s3023_s25 = smov (%p27_p0, %s26_s25), 0  ;;  %s3025_s26 = smov (!%p27_p0, %s29_s26), %s1983_s21 }
   0xa   : > { %p2074_p3 = por %p136_p2, %p135_p1  ;;  %p31_p5 = scmp.ge.s32.totalorder %s3025_s26, 2 }
   0xb   : > { %p142_p6 = scmp.eq.s32.totalorder %s1696_s24, 3  ;;  %p1699_p7 = scmp.ge.s32.totalorder %s1987_s22, 1 }
   0xc   : > { %p177_p8 = scmp.lt.s32.totalorder %s1987_s22, 5  ;;  %s3027_s26 = smov (%p31_p5, %s3025_s26), 0 }
   0xd   : > { %p2084_p9 = por %p142_p6, %p141_p4  ;;  %s122_s29 = ssub.s32 %s1983_s21, %s3027_s26 }
   0xe   : > { %p178_p10 = pnand %p1699_p7, %p177_p8  ;;  %s125_s30 = sadd.s32 1, %s1967_s17 }
   0xf   : > { %p123_p11 = scmp.eq.s32.totalorder %s122_s29, 0  ;;  %s200_s6 = sand.u32 (!%p178_p10), 1, %s1963_s16  }
  0x10   : > { %181 = sbr.rel (%p178_p10) target bundleno = 995 (0x3e3), region = 36  ;;  %p203_p12 = scmp.lt.s32.totalorder (!%p178_p10), %s1975_s19, 1 }
  0x11   : > { %s2092_s5 = scalar_select %p123_p11, %s1967_s17, %s125_s30  }
  0x12   : > { %s1700_s7 = sshll.u32 (!%p178_p10), %s200_s6, 3  ;;  %p1702_p13 = scmp.ne.s32.totalorder (!%p178_p10), %s1971_s18, 0 }
  0x13   : > { %s2102_s13 = scalar_lea.vmem (!%p178_p10), [#allocation4], %s1700_s7 }
  0x17   : > { %s204_s8 = scalar_select %p203_p12, %s1975_s19, 1 }
  0x18   : > { %212 = sbr.rel (%p1702_p13) target bundleno = 31 (0x1f), region = 40  ;;  %vm213_vm0 = vcmask (!%p1702_p13), 7168   ;;  %v1989_v0 = vmov (!%p1702_p13), 0.0  }
  0x19   : > { %s1770_s9 = smul.u32 264, %s204_s8  ;;  %214 = vst.msk [vmem:[#allocation2] sm:$0xff] (!%p1702_p13), %vm213_vm0, %v1989_v0  ;;  %215 = vst.msk [vmem:[#allocation3] sm:$0xff] (!%p1702_p13), %vm213_vm0, %v1989_v0 }
  0x1b   : > { %s207_s12 = scalar_lea.vmem %s3008_s0, %s1770_s9 }
  0x1f PF: > { %s1766_s14 = smul.u32 96, %s1971_s18  ;;  %vm571_vm1 = vcmask 1046528   ;;  %vm374_vm2 = vsmask.f32 7424  ;;  %s1990_s24 = smov 16   ;;  %vm797_vm4 = vcmask 1045504  }
  0x20   : > { %s1991_s29 = smov 8   ;;  %vm642_vm3 = vsmask.f32 6400  ;;  %s1992_s30 = smov 24   ;;  %vm868_vm5 = vsmask.f32 5376 }
  0x21   : > { %s2106_s23 = scalar_lea.vmem %s207_s12, %s1766_s14  ;;  %s1993_s7 = smov 32   ;;  %vm995_vm6 = vcmask 1044480   ;;  %vm1066_vm7 = vcmask 64512   ;;  %vm1095_vm8 = vcmask 130048   ;;  %vm1124_vm9 = vcmask 195584  }
  0x22   : > { %v2109_v1 = vld [vmem:[%s2106_s23 + $0x18] sm:$0xff]   ;;  %v2112_v2 = vld [vmem:[%s2106_s23 + $0x20] ss:$0 sps:$4 sm:$0x77]   ;;  %v2115_v3 = vld [vmem:[%s2106_s23 + $0xc] sm:$0xff]   ;;  %s1994_s8 = smov 40  }
  0x23   : > { %v578_v4 = vrot.slane %v2109_v1, 1  ;;  %v579_v5 = vrot.slane %v2112_v2, 1  ;;  %v2120_v6 = vld [vmem:[%s2106_s23 + $0x14] ss:$0 sps:$4 sm:$0x77]   ;;  %v2123_v7 = vld [vmem:[%s2106_s23 + $0x24] sm:$0xff]  }
  0x24   : > { %v575_v8 = vrot.slane %v2115_v3, 1  ;;  %v2127_v9 = vshrl.u32 %v2115_v3, 16  ;;  %v576_v11 = vrot.slane %v2120_v6, 1  ;;  %v2132_v12 = vld [vmem:[%s2106_s23 + $0x2c] ss:$0 sps:$4 sm:$0x77]  }
  0x25   : > { %v580_v10 = vsel %vm571_vm1, %v578_v4, %v579_v5  ;;  %v581_v13 = vrot.slane %v2123_v7, 1  ;;  %v2137_v14 = vshll.u32 %v2115_v3, 16  ;;  %v2140_v15 = vshll.u32 %v2120_v6, 16  ;;  %v2154_v21 = vld [vmem:[%s2106_s23 + $0x3c] sm:$0xff]   ;;  %v2183_v35 = vld [vmem:[%s2106_s23 + $0x48] sm:$0xff]   ;;  %s1995_s9 = smov 48  }
  0x26   : > { %618 = vrot.lane.b32.xlu0 %v580_v10, %s1990_s24  ;;  %v2143_v16 = vshrl.u32 %v2123_v7, 16  ;;  %v577_v17 = vsel %vm571_vm1, %v575_v8, %v576_v11  ;;  %v582_v18 = vrot.slane %v2132_v12, 1  ;;  %v2148_v19 = vshll.u32 %v2123_v7, 16  ;;  %v2172_v30 = vld [vmem:[%s2106_s23 + $0x44] ss:$0 sps:$4 sm:$0x77]  }
  0x27   : > { %v2151_v20 = vshll.u32 %v2132_v12, 16  ;;  %616 = vrot.lane.b32.xlu1 %v577_v17, %s1990_s24  ;;  %v392_v22 = vrot.slane %v2137_v14, 1  ;;  %v397_v23 = vrot.slane %v2140_v15, 1  ;;  %v2160_v24 = vshrl.u32 %v2109_v1, 16  ;;  %s1996_s10 = smov 56   ;;  %s1997_s11 = smov 112  }
  0x28   : > { %v2163_v25 = vshll.u32 %v2109_v1, 16  ;;  %v583_v26 = vsel %vm571_vm1, %v581_v13, %v582_v18  ;;  %v416_v27 = vrot.slane %v2148_v19, 1  ;;  %v2169_v29 = vshll.u32 %v2112_v2, 16  ;;  %v2195_v42 = vld [vmem:[%s2106_s23 + $0x50] ss:$0 sps:$4 sm:$0x77]  }
  0x29   : > { %v421_v28 = vrot.slane %v2151_v20, 1  ;;  %v393_v31 = vor.u32 %v392_v22, %v2127_v9  ;;  %v2177_v33 = vshrl.u32 %v2154_v21, 16  ;;  %v2180_v34 = vshll.u32 %v2154_v21, 16  ;;  %p1759_p0 = scmp.ne.s32.totalorder %s1971_s18, 1 }
  0x2a   : > { %v404_v32 = vrot.slane %v2163_v25, 1  ;;  %v417_v36 = vor.u32 %v416_v27, %v2143_v16  ;;  %v409_v37 = vrot.slane %v2169_v29, 1  ;;  %v2188_v38 = vshll.u32 %v2172_v30, 16 }
  0x2b   : > { %620 = vrot.lane.b32.xlu1 %v583_v26, %s1990_s24  ;;  %v398_v39 = vsel %vm374_vm2, %v393_v31, %v397_v23  ;;  %v440_v41 = vrot.slane %v2180_v34, 1  ;;  %v2198_v43 = vshrl.u32 %v2183_v35, 16  ;;  %v2204_v46 = vshll.u32 %v2183_v35, 16 }
  0x2c   : > { %v405_v40 = vor.u32 %v404_v32, %v2160_v24  ;;  %545 = vrot.lane.b32.xlu0 %v398_v39, %s1991_s29  ;;  %v422_v44 = vsel %vm374_vm2, %v417_v36, %v421_v28  ;;  %v445_v45 = vrot.slane %v2188_v38, 1  ;;  %v590_v47 = vrot.slane %v2183_v35, 1 }
  0x2d   : > { %v441_v49 = vor.u32 %v440_v41, %v2177_v33  ;;  %v2210_v50 = vshll.u32 %v2195_v42, 16  ;;  %v591_v51 = vrot.slane %v2195_v42, 1  ;;  %v452_v52 = vrot.slane %v2204_v46, 1 }
  0x2e   : > { %v410_v48 = vsel %vm374_vm2, %v405_v40, %v409_v37  ;;  %v587_v53 = vrot.slane %v2154_v21, 1  ;;  %v661_v54 = vrot.slane %v2160_v24, 1  ;;  %v588_v57 = vrot.slane %v2172_v30, 1 }
  0x2f   : > { %549 = vrot.lane.b32.xlu1 %v422_v44, %s1991_s29  ;;  %v446_v55 = vsel %vm374_vm2, %v441_v49, %v445_v45  ;;  %v457_v56 = vrot.slane %v2210_v50, 1  ;;  %v662_v58 = vrot.slane %v2163_v25, 2  ;;  %v453_v59 = vor.u32 %v452_v52, %v2198_v43 }
  0x30   : > { %547 = vrot.lane.b32.xlu0 %v410_v48, %s1991_s29  ;;  %v592_v60 = vsel %vm571_vm1, %v590_v47, %v591_v51  ;;  %v664_v61 = vshrl.u32 %v2112_v2, 16  ;;  %v667_v62 = vrot.slane %v2169_v29, 2  ;;  %v652_v0 = vrot.slane %v2127_v9, 1 }
  0x31   : > { %v663_v63 = vor.u32 %v662_v58, %v661_v54  ;;  %v653_v4 = vrot.slane %v2137_v14, 2  ;;  %v655_v5 = vshrl.u32 %v2120_v6, 16  ;;  %v458_v8 = vsel %vm374_vm2, %v453_v59, %v457_v56 }
  0x32   : > { %v666_v10 = vrot.slane %v664_v61, 1  ;;  %v658_v11 = vrot.slane %v2140_v15, 2  ;;  %v688_v13 = vrot.slane %v2177_v33, 1  ;;  %v689_v22 = vrot.slane %v2180_v34, 2 }
  0x33   : > { %553 = vrot.lane.b32.xlu1 %v446_v55, %s1991_s29  ;;  %v654_v17 = vor.u32 %v653_v4, %v652_v0  ;;  %v657_v18 = vrot.slane %v655_v5, 1  ;;  %v691_v23 = vshrl.u32 %v2172_v30, 16  ;;  %v694_v27 = vrot.slane %v2188_v38, 2 }
  0x34   : > { %555 = vrot.lane.b32.xlu0 %v458_v8, %s1991_s29  ;;  %v668_v26 = vor.u32 %v667_v62, %v666_v10  ;;  %v670_v28 = vrot.slane %v2143_v16, 1  ;;  %v671_v31 = vrot.slane %v2148_v19, 2  ;;  %v589_v32 = vsel %vm571_vm1, %v587_v53, %v588_v57 }
  0x35   : > { %v659_v36 = vor.u32 %v658_v11, %v657_v18  ;;  %v693_v37 = vrot.slane %v691_v23, 1  ;;  %v673_v39 = vshrl.u32 %v2132_v12, 16  ;;  %v676_v40 = vrot.slane %v2151_v20, 2 }
  0x36   : > { %v669_v41 = vsel %vm642_vm3, %v663_v63, %v668_v26  ;;  %v690_v44 = vor.u32 %v689_v22, %v688_v13  ;;  %v672_v49 = vor.u32 %v671_v31, %v670_v28  ;;  %v700_v51 = vshrl.u32 %v2195_v42, 16 }
  0x37   : > { %626 = vrot.lane.b32.xlu1 %v592_v60, %s1990_s24  ;;  %v675_v45 = vrot.slane %v673_v39, 1  ;;  %v660_v47 = vsel %vm642_vm3, %v654_v17, %v659_v36  ;;  %v695_v48 = vor.u32 %v694_v27, %v693_v37  ;;  %v697_v53 = vrot.slane %v2198_v43, 1 }
  0x38   : > { %624 = vrot.lane.b32.xlu0 %v589_v32, %s1990_s24  ;;  %v698_v54 = vrot.slane %v2204_v46, 2  ;;  %v703_v55 = vrot.slane %v2210_v50, 2  ;;  %v702_v56 = vrot.slane %v700_v51, 1  ;;  %v801_v57 = vrot.slane %v2115_v3, 2 }
  0x39   : > { %v677_v52 = vor.u32 %v676_v40, %v675_v45  ;;  %v802_v58 = vrot.slane %v2120_v6, 2  ;;  %v696_v59 = vsel %vm642_vm3, %v690_v44, %v695_v48  ;;  %v807_v4 = vrot.slane %v2123_v7, 2 }
  0x3a   : > { %v699_v62 = vor.u32 %v698_v54, %v697_v53  ;;  %v704_v63 = vor.u32 %v703_v55, %v702_v56  ;;  %v808_v8 = vrot.slane %v2132_v12, 2  ;;  %v804_v10 = vrot.slane %v2109_v1, 2 }
  0x3b   : > { %773 = vrot.lane.b32.xlu1 %v669_v41, %s1992_s30  ;;  %v678_v60 = vsel %vm642_vm3, %v672_v49, %v677_v52  ;;  %v803_v0 = vsel %vm797_vm4, %v801_v57, %v802_v58  ;;  %v805_v11 = vrot.slane %v2112_v2, 2  ;;  %v816_v13 = vrot.slane %v2183_v35, 2 }
  0x3c   : > { %771 = vrot.lane.b32.xlu0 %v660_v47, %s1992_s30  ;;  %v705_v17 = vsel %vm642_vm3, %v699_v62, %v704_v63  ;;  %v817_v18 = vrot.slane %v2195_v42, 2  ;;  %v883_v22 = vrot.slane %v2160_v24, 2  ;;  %v884_v26 = vrot.slane %v2163_v25, 3 }
  0x3d   : > { %v886_v27 = vrot.slane %v664_v61, 2  ;;  %v887_v28 = vrot.slane %v2169_v29, 3  ;;  %v876_v31 = vrot.slane %v2127_v9, 2  ;;  %v877_v32 = vrot.slane %v2137_v14, 3 }
  0x3e   : > { %v809_v36 = vsel %vm797_vm4, %v807_v4, %v808_v8  ;;  %v879_v37 = vrot.slane %v655_v5, 2  ;;  %v880_v24 = vrot.slane %v2140_v15, 3  ;;  %v806_v25 = vsel %vm797_vm4, %v804_v10, %v805_v11  ;;  %v2331_v4 = vld [vmem:[%s2106_s23 + $0x5c] ss:$0 sps:$4 sm:$0x77]  }
  0x3f   : > { %779 = vrot.lane.b32.xlu1 %v696_v59, %s1992_s30  ;;  %v813_v29 = vrot.slane %v2154_v21, 2  ;;  %v814_v61 = vrot.slane %v2172_v30, 2  ;;  %v818_v40 = vsel %vm797_vm4, %v816_v13, %v817_v18  ;;  %v885_v9 = vor.u32 %v884_v26, %v883_v22  ;;  %v2317_v59 = vld [vmem:[%s2106_s23 + $0x54] sm:$0xff]  }
  0x40   : > { %775 = vrot.lane.b32.xlu0 %v678_v60, %s1992_s30  ;;  %v888_v14 = vor.u32 %v887_v28, %v886_v27  ;;  %v878_v41 = vor.u32 %v877_v32, %v876_v31  ;;  %v904_v44 = vrot.slane %v2177_v33, 2  ;;  %v905_v5 = vrot.slane %v2180_v34, 3  ;;  %v2321_v60 = vld [vmem:[%s2106_s23 + $0x30] sm:$0xff]   ;;  %v2338_v11 = vld [vmem:[%s2106_s23 + $0x38] ss:$0 sps:$4 sm:$0x77]  }
  0x41   : > { %v907_v15 = vrot.slane %v691_v23, 2  ;;  %v881_v45 = vor.u32 %v880_v24, %v879_v37  ;;  %v908_v47 = vrot.slane %v2188_v38, 3  ;;  %v890_v48 = vrot.slane %v2143_v16, 2 }
  0x42   : > { %v891_v49 = vrot.slane %v2148_v19, 3  ;;  %v815_v52 = vsel %vm797_vm4, %v813_v29, %v814_v61  ;;  %v893_v53 = vrot.slane %v673_v39, 2  ;;  %v894_v33 = vrot.slane %v2151_v20, 3 }
  0x43   : > { %842 = vrot.lane.b32.xlu1 %v803_v0, %s1993_s7  ;;  %v889_v34 = vsel %vm868_vm5, %v885_v9, %v888_v14  ;;  %v906_v23 = vor.u32 %v905_v5, %v904_v44  ;;  %v882_v38 = vsel %vm868_vm5, %v878_v41, %v881_v45  ;;  %v909_v16 = vor.u32 %v908_v47, %v907_v15 }
  0x44   : > { %781 = vrot.lane.b32.xlu0 %v705_v17, %s1992_s30  ;;  %v892_v54 = vor.u32 %v891_v49, %v890_v48  ;;  %v911_v19 = vrot.slane %v2198_v43, 2  ;;  %v895_v55 = vor.u32 %v894_v33, %v893_v53  ;;  %v912_v39 = vrot.slane %v2204_v46, 3 }
  0x45   : > { %v914_v20 = vrot.slane %v700_v51, 2  ;;  %v915_v56 = vrot.slane %v2210_v50, 3  ;;  %v910_v57 = vsel %vm868_vm5, %v906_v23, %v909_v16  ;;  %v999_v58 = vrot.slane %v2115_v3, 3 }
  0x46   : > { %v1000_v43 = vrot.slane %v2120_v6, 3  ;;  %v896_v46 = vsel %vm868_vm5, %v892_v54, %v895_v55  ;;  %v913_v51 = vor.u32 %v912_v39, %v911_v19  ;;  %v1005_v62 = vrot.slane %v2123_v7, 3 }
  0x47   : > { %846 = vrot.lane.b32.xlu1 %v809_v36, %s1993_s7  ;;  %v916_v50 = vor.u32 %v915_v56, %v914_v20  ;;  %v1006_v63 = vrot.slane %v2132_v12, 3  ;;  %v1002_v3 = vrot.slane %v2109_v1, 3  ;;  %v1003_v6 = vrot.slane %v2112_v2, 3 }
  0x48   : > { %844 = vrot.lane.b32.xlu0 %v806_v25, %s1993_s7  ;;  %v1001_v0 = vsel %vm995_vm6, %v999_v58, %v1000_v43  ;;  %v2334_v8 = vshll.u32 %v2317_v59, 16  ;;  %v2341_v7 = vshll.u32 %v2321_v60, 16  ;;  %v1014_v12 = vrot.slane %v2183_v35, 3 }
  0x49   : > { %v917_v10 = vsel %vm868_vm5, %v913_v51, %v916_v50  ;;  %v1007_v1 = vsel %vm995_vm6, %v1005_v62, %v1006_v63  ;;  %v1004_v2 = vsel %vm995_vm6, %v1002_v3, %v1003_v6  ;;  %v1015_v13 = vrot.slane %v2195_v42, 3  ;;  %v2388_v3 = vld [vmem:[%s2106_s23 + $0x60] sm:$0xff]  }
  0x4a   : > { %v1011_v17 = vrot.slane %v2154_v21, 3  ;;  %v460_v18 = vshrl.u32 %v2317_v59, 16  ;;  %v464_v22 = vrot.slane %v2334_v8, 1  ;;  %v467_v26 = vshll.u32 %v2331_v4, 16 }
  0x4b   : > { %852 = vrot.lane.b32.xlu1 %v818_v40, %s1993_s7  ;;  %v1012_v27 = vrot.slane %v2172_v30, 3  ;;  %v424_v28 = vshrl.u32 %v2321_v60, 16  ;;  %v428_v31 = vrot.slane %v2341_v7, 1  ;;  %v431_v35 = vshll.u32 %v2338_v11, 16 }
  0x4c   : > { %850 = vrot.lane.b32.xlu0 %v815_v52, %s1993_s7  ;;  %v1016_v21 = vsel %vm995_vm6, %v1014_v12, %v1015_v13  ;;  %v465_v42 = vor.u32 %v464_v22, %v460_v18  ;;  %v469_v32 = vrot.slane %v467_v26, 1  ;;  %v709_v36 = vshrl.u32 %v2331_v4, 16  ;;  %v1867_v12 = vld [vmem:[%s2106_s23 + $0x68] ss:$0 sps:$4 sm:$0x77]  }
  0x4d   : > { %v1013_v37 = vsel %vm995_vm6, %v1011_v17, %v1012_v27  ;;  %v429_v24 = vor.u32 %v428_v31, %v424_v28  ;;  %v433_v30 = vrot.slane %v431_v35, 1  ;;  %v682_v25 = vshrl.u32 %v2338_v11, 16 }
  0x4e   : > { %v593_v29 = vrot.slane %v2317_v59, 1  ;;  %v594_v61 = vrot.slane %v2331_v4, 1  ;;  %v584_v40 = vrot.slane %v2321_v60, 1  ;;  %v585_v9 = vrot.slane %v2338_v11, 1 }
  0x4f   : > { %971 = vrot.lane.b32.xlu1 %v889_v34, %s1994_s8  ;;  %v706_v14 = vrot.slane %v460_v18, 1  ;;  %v707_v41 = vrot.slane %v2334_v8, 2  ;;  %v470_v44 = vsel %vm374_vm2, %v465_v42, %v469_v32  ;;  %v711_v5 = vrot.slane %v709_v36, 1 }
  0x50   : > { %969 = vrot.lane.b32.xlu0 %v882_v38, %s1994_s8  ;;  %v712_v15 = vrot.slane %v467_v26, 2  ;;  %v679_v45 = vrot.slane %v424_v28, 1  ;;  %v434_v47 = vsel %vm374_vm2, %v429_v24, %v433_v30  ;;  %v680_v48 = vrot.slane %v2341_v7, 2 }
  0x51   : > { %v684_v49 = vrot.slane %v682_v25, 1  ;;  %v685_v52 = vrot.slane %v431_v35, 2  ;;  %v595_v53 = vsel %vm571_vm1, %v593_v29, %v594_v61  ;;  %v708_v33 = vor.u32 %v707_v41, %v706_v14  ;;  %v2411_v61 = vld [vmem:[%s2106_s23 + $0x6c] sm:$0xff]   ;;  %v2417_v41 = vld [vmem:[%s2106_s23 + $0x74] ss:$0 sps:$4 sm:$0x77]  }
  0x52   : > { %v713_v34 = vor.u32 %v712_v15, %v711_v5  ;;  %v586_v23 = vsel %vm571_vm1, %v584_v40, %v585_v9  ;;  %v681_v38 = vor.u32 %v680_v48, %v679_v45  ;;  %v819_v54 = vrot.slane %v2317_v59, 2 }
  0x53   : > { %977 = vrot.lane.b32.xlu1 %v910_v57, %s1994_s8  ;;  %v686_v16 = vor.u32 %v685_v52, %v684_v49  ;;  %v820_v19 = vrot.slane %v2331_v4, 2  ;;  %v810_v55 = vrot.slane %v2321_v60, 2  ;;  %v811_v39 = vrot.slane %v2338_v11, 2 }
  0x54   : > { %973 = vrot.lane.b32.xlu0 %v896_v46, %s1994_s8  ;;  %v918_v20 = vrot.slane %v460_v18, 2  ;;  %v919_v56 = vrot.slane %v2334_v8, 3  ;;  %v714_v57 = vsel %vm642_vm3, %v708_v33, %v713_v34  ;;  %v921_v58 = vrot.slane %v709_v36, 2 }
  0x55   : > { %v922_v43 = vrot.slane %v467_v26, 3  ;;  %v897_v46 = vrot.slane %v424_v28, 2  ;;  %v687_v51 = vsel %vm642_vm3, %v681_v38, %v686_v16  ;;  %v898_v50 = vrot.slane %v2341_v7, 3 }
  0x56   : > { %v900_v62 = vrot.slane %v682_v25, 2  ;;  %v901_v63 = vrot.slane %v431_v35, 3  ;;  %v821_v6 = vsel %vm797_vm4, %v819_v54, %v820_v19  ;;  %v474_v13 = vshll.u32 %v2388_v3, 16 }
  0x57   : > { %1040 = vrot.lane.b32.xlu1 %v1001_v0, %s1995_s9  ;;  %v920_v0 = vor.u32 %v919_v56, %v918_v20  ;;  %v923_v8 = vor.u32 %v922_v43, %v921_v58  ;;  %v1017_v7 = vrot.slane %v2317_v59, 3  ;;  %v1018_v17 = vrot.slane %v2331_v4, 3 }
  0x58   : > { %979 = vrot.lane.b32.xlu0 %v917_v10, %s1994_s8  ;;  %v812_v10 = vsel %vm797_vm4, %v810_v55, %v811_v39  ;;  %v1008_v22 = vrot.slane %v2321_v60, 3  ;;  %v1009_v26 = vrot.slane %v2338_v11, 3  ;;  %v472_v27 = vshrl.u32 %v2388_v3, 16 }
  0x59   : > { %v924_v18 = vsel %vm868_vm5, %v920_v0, %v923_v8  ;;  %v476_v31 = vrot.slane %v474_v13, 1  ;;  %v479_v35 = vshll.u32 %v1867_v12, 16  ;;  %v596_v4 = vrot.slane %v2388_v3, 1 }
  0x5a   : > { %v597_v42 = vrot.slane %v1867_v12, 1  ;;  %v1019_v32 = vsel %vm995_vm6, %v1017_v7, %v1018_v17  ;;  %v1010_v11 = vsel %vm995_vm6, %v1008_v22, %v1009_v26  ;;  %v715_v36 = vrot.slane %v472_v27, 1 }
  0x5b   : > { %1044 = vrot.lane.b32.xlu1 %v1007_v1, %s1995_s9  ;;  %v899_v1 = vor.u32 %v898_v50, %v897_v46  ;;  %v477_v24 = vor.u32 %v476_v31, %v472_v27  ;;  %v481_v30 = vrot.slane %v479_v35, 1  ;;  %v721_v29 = vrot.slane %v479_v35, 2 }
  0x5c   : > { %1042 = vrot.lane.b32.xlu0 %v1004_v2, %s1995_s9  ;;  %v902_v2 = vor.u32 %v901_v63, %v900_v62  ;;  %v598_v40 = vsel %vm571_vm1, %v596_v4, %v597_v42  ;;  %v822_v9 = vrot.slane %v2388_v3, 2  ;;  %v823_v14 = vrot.slane %v1867_v12, 2 }
  0x5d   : > { %v926_v5 = vrot.slane %v474_v13, 3  ;;  %v929_v45 = vrot.slane %v479_v35, 3  ;;  %v486_v52 = vshll.u32 %v2411_v61, 16  ;;  %v1020_v33 = vrot.slane %v2388_v3, 3 }
  0x5e   : > { %v903_v28 = vsel %vm868_vm5, %v899_v1, %v902_v2  ;;  %v1021_v38 = vrot.slane %v1867_v12, 3  ;;  %v491_v16 = vshll.u32 %v2417_v41, 16  ;;  %v484_v19 = vshrl.u32 %v2411_v61, 16  ;;  %v2444_v1 = vld [vmem:[%s2106_s23 + $0x80] ss:$0 sps:$4 sm:$0x77]  }
  0x5f   : > { %1050 = vrot.lane.b32.xlu1 %v1016_v21, %s1995_s9  ;;  %v718_v21 = vshrl.u32 %v1867_v12, 16  ;;  %v488_v55 = vrot.slane %v486_v52, 1  ;;  %v727_v39 = vshrl.u32 %v2417_v41, 16  ;;  %v599_v20 = vrot.slane %v2411_v61, 1 }
  0x60   : > { %1048 = vrot.lane.b32.xlu0 %v1013_v37, %s1995_s9  ;;  %v716_v37 = vrot.slane %v474_v13, 2  ;;  %v600_v56 = vrot.slane %v2417_v41, 1  ;;  %v1022_v58 = vsel %vm995_vm6, %v1020_v33, %v1021_v38  ;;  %v493_v43 = vrot.slane %v491_v16, 1 }
  0x61   : > { %v720_v25 = vrot.slane %v718_v21, 1  ;;  %v928_v15 = vrot.slane %v718_v21, 2  ;;  %v724_v46 = vrot.slane %v484_v19, 1  ;;  %v725_v50 = vrot.slane %v486_v52, 2 }
  0x62   : > { %v717_v48 = vor.u32 %v716_v37, %v715_v36  ;;  %v729_v62 = vrot.slane %v727_v39, 1  ;;  %v730_v63 = vrot.slane %v491_v16, 2  ;;  %v601_v0 = vsel %vm571_vm1, %v599_v20, %v600_v56 }
  0x63   : > { %557 = vrot.lane.b32.xlu1 %v470_v44, %s1991_s29  ;;  %v925_v44 = vrot.slane %v472_v27, 2  ;;  %v722_v49 = vor.u32 %v721_v29, %v720_v25  ;;  %v825_v8 = vrot.slane %v2411_v61, 2  ;;  %v932_v2 = vrot.slane %v484_v19, 2 }
  0x64   : > { %551 = vrot.lane.b32.xlu0 %v434_v47, %s1991_s29  ;;  %v482_v47 = vsel %vm374_vm2, %v477_v24, %v481_v30  ;;  %v933_v12 = vrot.slane %v486_v52, 3  ;;  %v935_v13 = vrot.slane %v727_v39, 2  ;;  %v936_v7 = vrot.slane %v491_v16, 3 }
  0x65   : > { %v927_v34 = vor.u32 %v926_v5, %v925_v44  ;;  %v723_v54 = vsel %vm642_vm3, %v717_v48, %v722_v49  ;;  %v731_v22 = vor.u32 %v730_v63, %v729_v62  ;;  %v1024_v21 = vrot.slane %v2417_v41, 3  ;;  %v2465_v5 = vld [vmem:[%s2106_s23 + $0x84] sm:$0xff]   ;;  %v2472_v48 = vld [vmem:[%s2106_s23 + $0x8c] ss:$0 sps:$4 sm:$0x77]  }
  0x66   : > { %v934_v31 = vor.u32 %v933_v12, %v932_v2  ;;  %v937_v35 = vor.u32 %v936_v7, %v935_v13  ;;  %v503_v4 = vshll.u32 %v2444_v1, 16  ;;  %v736_v36 = vshrl.u32 %v2444_v1, 16 }
  0x67   : > { %628 = vrot.lane.b32.xlu1 %v595_v53, %s1990_s24  ;;  %v824_v53 = vsel %vm797_vm4, %v822_v9, %v823_v14  ;;  %v603_v24 = vrot.slane %v2444_v1, 1  ;;  %v510_v16 = vshll.u32 %v2465_v5, 16  ;;  %v1027_v20 = vrot.slane %v2444_v1, 3 }
  0x68   : > { %622 = vrot.lane.b32.xlu0 %v586_v23, %s1990_s24  ;;  %v930_v23 = vor.u32 %v929_v45, %v928_v15  ;;  %v938_v30 = vsel %vm868_vm5, %v934_v31, %v937_v35  ;;  %v505_v29 = vrot.slane %v503_v4, 1  ;;  %v739_v44 = vrot.slane %v503_v4, 2 }
  0x69   : > { %v943_v33 = vrot.slane %v503_v4, 3  ;;  %v515_v56 = vshll.u32 %v2472_v48, 16  ;;  %v743_v12 = vrot.slane %v510_v16, 2  ;;  %v947_v31 = vrot.slane %v510_v16, 3 }
  0x6a   : > { %vm1153_vm10 = vcmask 261120   ;;  %vm1182_vm11 = vcmask 326656   ;;  %vm1211_vm12 = vcmask 392192   ;;  %vm1481_vm13 = vcmask 785408  }
  0x6b   : > { %783 = vrot.lane.b32.xlu1 %v714_v57, %s1992_s30  ;;  %v931_v57 = vsel %vm868_vm5, %v927_v34, %v930_v23  ;;  %v748_v7 = vrot.slane %v515_v56, 2  ;;  %vm1298_vm14 = vcmask 457728   ;;  %vm1315_vm15 = vcmask 916480  }
  0x6c   : > { %777 = vrot.lane.b32.xlu0 %v687_v51, %s1992_s30  ;;  %v489_v51 = vor.u32 %v488_v55, %v484_v19  ;;  %vm1545_vm0 = vcmask 7168  }
  0x6e   : > { %v494_v17 = vsel %vm374_vm2, %v489_v51, %v493_v43  ;;  %v512_v43 = vrot.slane %v510_v16, 1  ;;  %v605_v51 = vrot.slane %v2465_v5, 1 }
  0x6f   : > { %854 = vrot.lane.b32.xlu1 %v821_v6, %s1993_s7  ;;  %v2437_v6 = vld [vmem:[%s2106_s23 + $0x78] sm:$0xff]  }
  0x70   : > { %848 = vrot.lane.b32.xlu0 %v812_v10, %s1993_s7  ;;  %v826_v10 = vrot.slane %v2417_v41, 2  ;;  %v498_v26 = vshll.u32 %v2437_v6, 16  ;;  %v602_v37 = vrot.slane %v2437_v6, 1  ;;  %v738_v41 = vrot.slane %v736_v36, 1 }
  0x71   : > { %v828_v45 = vrot.slane %v2437_v6, 2  ;;  %v1026_v19 = vrot.slane %v2437_v6, 3 }
  0x72   : > { %v827_v27 = vsel %vm797_vm4, %v825_v8, %v826_v10  ;;  %v734_v14 = vrot.slane %v498_v26, 2  ;;  %v604_v15 = vsel %vm571_vm1, %v602_v37, %v603_v24  ;;  %v940_v52 = vrot.slane %v498_v26, 3 }
  0x73   : > { %981 = vrot.lane.b32.xlu1 %v924_v18, %s1994_s8  ;;  %v726_v18 = vor.u32 %v725_v50, %v724_v46  ;;  %v740_v38 = vor.u32 %v739_v44, %v738_v41  ;;  %v745_v46 = vshrl.u32 %v2472_v48, 16  ;;  %v606_v50 = vrot.slane %v2472_v48, 1 }
  0x74   : > { %975 = vrot.lane.b32.xlu0 %v903_v28, %s1994_s8  ;;  %v1023_v28 = vrot.slane %v2411_v61, 3  ;;  %v517_v8 = vrot.slane %v515_v56, 1  ;;  %v1029_v24 = vrot.slane %v2465_v5, 3 }
  0x75   : > { %v732_v42 = vsel %vm642_vm3, %v726_v18, %v731_v22  ;;  %v747_v13 = vrot.slane %v745_v46, 1  ;;  %v607_v18 = vsel %vm571_vm1, %v605_v51, %v606_v50  ;;  %v831_v22 = vrot.slane %v2465_v5, 2 }
  0x76   : > { %v1025_v25 = vsel %vm995_vm6, %v1023_v28, %v1024_v21  ;;  %v949_v35 = vrot.slane %v745_v46, 2  ;;  %v950_v21 = vrot.slane %v515_v56, 3 }
  0x77   : > { %1052 = vrot.lane.b32.xlu1 %v1019_v32, %s1995_s9  ;;  %v496_v32 = vshrl.u32 %v2437_v6, 16 }
  0x78   : > { %1046 = vrot.lane.b32.xlu0 %v1010_v11, %s1995_s9  ;;  %v500_v11 = vrot.slane %v498_v26, 1  ;;  %v832_v26 = vrot.slane %v2472_v48, 2 }
  0x79   : > { %v939_v49 = vrot.slane %v496_v32, 2 }
  0x7a   : > { %v501_v9 = vor.u32 %v500_v11, %v496_v32  ;;  %v749_v11 = vor.u32 %v748_v7, %v747_v13  ;;  %v2557_v13 = vld [vmem:[%s2106_s23 + $0xa4] ss:$0 sps:$4 sm:$0x77]  }
  0x7b   : > { %630 = vrot.lane.b32.xlu1 %v598_v40, %s1990_s24  ;;  %v733_v40 = vrot.slane %v496_v32, 1  ;;  %v941_v55 = vor.u32 %v940_v52, %v939_v49 }
  0x7c   : > { %559 = vrot.lane.b32.xlu0 %v482_v47, %s1991_s29  ;;  %v829_v47 = vrot.slane %v2444_v1, 2  ;;  %v506_v34 = vsel %vm374_vm2, %v501_v9, %v505_v29 }
  0x7d   : > { %v735_v23 = vor.u32 %v734_v14, %v733_v40  ;;  %v951_v40 = vor.u32 %v950_v21, %v949_v35 }
  0x7f   : > { %856 = vrot.lane.b32.xlu1 %v824_v53, %s1993_s7  ;;  %v942_v53 = vrot.slane %v736_v36, 2 }
  0x80   : > { %785 = vrot.lane.b32.xlu0 %v723_v54, %s1992_s30  ;;  %v830_v54 = vsel %vm797_vm4, %v828_v45, %v829_v47 }
  0x81   : > { %v944_v39 = vor.u32 %v943_v33, %v942_v53 }
  0x83   : > { %1054 = vrot.lane.b32.xlu1 %v1022_v58, %s1995_s9  ;;  %v508_v58 = vshrl.u32 %v2465_v5, 16  ;;  %v945_v63 = vsel %vm868_vm5, %v941_v55, %v944_v39  ;;  %v2538_v39 = vld [vmem:[%s2106_s23 + $0x9c] sm:$0xff]  }
  0x84   : > { %983 = vrot.lane.b32.xlu0 %v931_v57, %s1994_s8  ;;  %v741_v57 = vsel %vm642_vm3, %v735_v23, %v740_v38  ;;  %v2533_v23 = vld [vmem:[%s2106_s23] sm:$0xff]   ;;  %v2560_v7 = vshll.u32 %v2538_v39, 16 }
  0x85   : > { %v742_v10 = vrot.slane %v508_v58, 1  ;;  %v513_v2 = vor.u32 %v512_v43, %v508_v58  ;;  %v946_v28 = vrot.slane %v508_v58, 2  ;;  %v2570_v21 = vshrl.u32 %v2533_v23, 16 }
  0x87   : > { %632 = vrot.lane.b32.xlu1 %v601_v0, %s1990_s24  ;;  %v1028_v0 = vsel %vm995_vm6, %v1026_v19, %v1027_v20  ;;  %v744_v32 = vor.u32 %v743_v12, %v742_v10  ;;  %v948_v29 = vor.u32 %v947_v31, %v946_v28 }
  0x88   : > { %561 = vrot.lane.b32.xlu0 %v494_v17, %s1991_s29  ;;  %v2497_v17 = vld [vmem:[%s2106_s23 + $0x90] sm:$0xff]  }
  0x89   : > { %v522_v36 = vshll.u32 %v2497_v17, 16  ;;  %v750_v41 = vsel %vm642_vm3, %v744_v32, %v749_v11  ;;  %v520_v44 = vshrl.u32 %v2497_v17, 16  ;;  %v608_v49 = vrot.slane %v2497_v17, 1 }
  0x8a   : > { %v952_v52 = vsel %vm868_vm5, %v948_v29, %v951_v40  ;;  %v834_v56 = vrot.slane %v2497_v17, 2  ;;  %v1032_v28 = vrot.slane %v2497_v17, 3 }
  0x8b   : > { %858 = vrot.lane.b32.xlu1 %v827_v27, %s1993_s7  ;;  %v2504_v27 = vld [vmem:[%s2106_s23 + $0x98] ss:$0 sps:$4 sm:$0x77]   ;;  %v953_v58 = vrot.slane %v520_v44, 2  ;;  %v954_v43 = vrot.slane %v522_v36, 3 }
  0x8c   : > { %787 = vrot.lane.b32.xlu0 %v732_v42, %s1992_s30  ;;  %v518_v42 = vsel %vm374_vm2, %v513_v2, %v517_v8  ;;  %v527_v9 = vshll.u32 %v2504_v27, 16  ;;  %v754_v45 = vshrl.u32 %v2504_v27, 16  ;;  %v609_v33 = vrot.slane %v2504_v27, 1 }
  0x8d   : > { %v1033_v31 = vrot.slane %v2504_v27, 3 }
  0x8e   : > { %v529_v53 = vrot.slane %v527_v9, 1  ;;  %v756_v19 = vrot.slane %v754_v45, 1  ;;  %v757_v55 = vrot.slane %v527_v9, 2  ;;  %v610_v46 = vsel %vm571_vm1, %v608_v49, %v609_v33 }
  0x8f   : > { %1056 = vrot.lane.b32.xlu1 %v1025_v25, %s1995_s9  ;;  %v833_v25 = vsel %vm797_vm4, %v831_v22, %v832_v26  ;;  %v956_v51 = vrot.slane %v754_v45, 2  ;;  %v957_v50 = vrot.slane %v527_v9, 3  ;;  %v955_v26 = vor.u32 %v954_v43, %v953_v58 }
  0x90   : > { %985 = vrot.lane.b32.xlu0 %v938_v30, %s1994_s8  ;;  %v1030_v30 = vrot.slane %v2472_v48, 3  ;;  %v758_v12 = vor.u32 %v757_v55, %v756_v19  ;;  %v1034_v29 = vsel %vm995_vm6, %v1032_v28, %v1033_v31  ;;  %v763_v49 = vshrl.u32 %v2557_v13, 16 }
  0x91   : > { %v958_v35 = vor.u32 %v957_v50, %v956_v51  ;;  %v612_v33 = vrot.slane %v2557_v13, 1  ;;  %v643_v19 = vrot.slane %v2570_v21, 1  ;;  %v761_v51 = vrot.slane %v2560_v7, 2 }
  0x92   : > { %v1031_v48 = vsel %vm995_vm6, %v1029_v24, %v1030_v30  ;;  %v2580_v24 = vshrl.u32 %v2538_v39, 16  ;;  %v2584_v30 = vshll.u32 %v2557_v13, 16  ;;  %v765_v50 = vrot.slane %v763_v49, 1 }
  0x93   : > { %634 = vrot.lane.b32.xlu1 %v604_v15, %s1990_s24  ;;  %v524_v15 = vrot.slane %v522_v36, 1 }
  0x94   : > { %563 = vrot.lane.b32.xlu0 %v506_v34, %s1991_s29  ;;  %v751_v34 = vrot.slane %v520_v44, 1 }
  0x95   : > { %v525_v16 = vor.u32 %v524_v15, %v520_v44  ;;  %v959_v15 = vsel %vm868_vm5, %v955_v26, %v958_v35 }
  0x97   : > { %860 = vrot.lane.b32.xlu1 %v830_v54, %s1993_s7  ;;  %v752_v54 = vrot.slane %v522_v36, 2  ;;  %v530_v10 = vsel %vm374_vm2, %v525_v16, %v529_v53  ;;  %v611_v53 = vrot.slane %v2538_v39, 1 }
  0x98   : > { %789 = vrot.lane.b32.xlu0 %v741_v57, %s1992_s30  ;;  %v2490_v62 = vpop.permute.xlu0 %618  ;;  %v835_v57 = vrot.slane %v2504_v27, 2  ;;  %v536_v27 = vrot.slane %v2560_v7, 1 }
  0x99   : > { %v2494_v1 = vpop.permute.xlu1 %616  ;;  %v753_v2 = vor.u32 %v752_v54, %v751_v34  ;;  %v572_v34 = vrot.slane %v2533_v23, 1  ;;  %v760_v54 = vrot.slane %v2580_v24, 1  ;;  %v613_v31 = vsel %vm571_vm1, %v611_v53, %v612_v33 }
  0x9a   : > { %v836_v22 = vsel %vm797_vm4, %v834_v56, %v835_v57  ;;  %v537_v45 = vor.u32 %v536_v27, %v2580_v24  ;;  %v837_v27 = vrot.slane %v2538_v39, 2 }
  0x9b   : > { %1058 = vrot.lane.b32.xlu1 %v1028_v0, %s1995_s9  ;;  %v2551_v0 = vshll.u32 %v2533_v23, 16  ;;  %v759_v36 = vsel %vm642_vm3, %v753_v2, %v758_v12  ;;  %v762_v35 = vor.u32 %v761_v51, %v760_v54 }
  0x9c   : > { %987 = vrot.lane.b32.xlu0 %v945_v63, %s1994_s8  ;;  %v2548_v63 = vld [vmem:[%s2106_s23 + $0x8] ss:$0 sps:$4 sm:$0x77]  }
  0x9d   : > { %v2507_v4 = vpop.permute.xlu1 %620  ;;  %v2574_v32 = vshll.u32 %v2548_v63, 16  ;;  %v573_v16 = vrot.slane %v2548_v63, 1  ;;  %v644_v56 = vrot.slane %v2551_v0, 2  ;;  %v870_v53 = vrot.slane %v2551_v0, 3 }
  0x9e   : > { %v2511_v37 = vpop.permute.xlu0 %545 }
  0x9f   : > { %636 = vrot.lane.b32.xlu1 %v607_v18, %s1990_s24  ;;  %v385_v9 = vrot.slane %v2574_v32, 1  ;;  %v649_v58 = vrot.slane %v2574_v32, 2  ;;  %v574_v12 = vsel %vm571_vm1, %v572_v34, %v573_v16  ;;  %v873_v34 = vrot.slane %v2574_v32, 3 }
  0xa0   : > { %565 = vrot.lane.b32.xlu0 %v518_v42, %s1991_s29  ;;  %v380_v42 = vrot.slane %v2551_v0, 1 }
  0xa1   : > { %v2519_v14 = vpop.permute.xlu1 %549 }
  0xa2   : > { %v2524_v47 = vpop.permute.xlu0 %547  ;;  %v381_v40 = vor.u32 %v380_v42, %v2570_v21 }
  0xa3   : > { %862 = vrot.lane.b32.xlu1 %v833_v25, %s1993_s7 }
  0xa4   : > { %791 = vrot.lane.b32.xlu0 %v750_v41, %s1992_s30  ;;  %v646_v41 = vshrl.u32 %v2548_v63, 16  ;;  %v386_v55 = vsel %vm374_vm2, %v381_v40, %v385_v9  ;;  %v798_v40 = vrot.slane %v2533_v23, 2  ;;  %v799_v9 = vrot.slane %v2548_v63, 2 }
  0xa5   : > { %v2535_v38 = vpop.permute.xlu1 %553 }
  0xa6   : > { %v2540_v20 = vpop.permute.xlu0 %555  ;;  %v648_v57 = vrot.slane %v646_v41, 1  ;;  %v872_v33 = vrot.slane %v646_v41, 2 }
  0xa7   : > { %1060 = vrot.lane.b32.xlu1 %v1031_v48, %s1995_s9  ;;  %v541_v48 = vrot.slane %v2584_v30, 1 }
  0xa8   : > { %989 = vrot.lane.b32.xlu0 %v952_v52, %s1994_s8  ;;  %v650_v26 = vor.u32 %v649_v58, %v648_v57  ;;  %v874_v41 = vor.u32 %v873_v34, %v872_v33 }
  0xa9   : > { %v2553_v8 = vpop.permute.xlu1 %626 }
  0xaa   : > { %v2562_v18 = vpop.permute.xlu0 %624 }
  0xab   : > { %638 = vrot.lane.b32.xlu1 %v610_v46, %s1990_s24  ;;  %v542_v46 = vsel %vm374_vm2, %v537_v45, %v541_v48  ;;  %v869_v45 = vrot.slane %v2570_v21, 2  ;;  %v800_v21 = vsel %vm797_vm4, %v798_v40, %v799_v9  ;;  %v1886_v40 = vld [vmem:[%s2106_s23 + $0x18] sm:$0xff]  }
  0xac   : > { %567 = vrot.lane.b32.xlu0 %v530_v10, %s1991_s29  ;;  %v766_v10 = vrot.slane %v2584_v30, 2  ;;  %v1887_v9 = vld [vmem:[%s2106_s23 + $0x3c] sm:$0xff]  }
  0xad   : > { %v2576_v11 = vpop.permute.xlu1 %773  ;;  %v871_v0 = vor.u32 %v870_v53, %v869_v45 }
  0xae   : > { %v2586_v25 = vpop.permute.xlu0 %771  ;;  %v767_v42 = vor.u32 %v766_v10, %v765_v50 }
  0xaf   : > { %864 = vrot.lane.b32.xlu1 %v836_v22, %s1993_s7  ;;  %v645_v22 = vor.u32 %v644_v56, %v643_v19  ;;  %v961_v19 = vrot.slane %v2560_v7, 3  ;;  %v875_v7 = vsel %vm868_vm5, %v871_v0, %v874_v41 }
  0xb0   : > { %793 = vrot.lane.b32.xlu0 %v759_v36, %s1992_s30  ;;  %v768_v54 = vsel %vm642_vm3, %v762_v35, %v767_v42 }
  0xb1   : > { %v2594_v44 = vpop.permute.xlu1 %779  ;;  %v651_v48 = vsel %vm642_vm3, %v645_v22, %v650_v26  ;;  %v1036_v22 = vrot.slane %v2557_v13, 3 }
  0xb2   : > { %v2600_v52 = vpop.permute.xlu0 %775 }
  0xb3   : > { %1062 = vrot.lane.b32.xlu1 %v1034_v29, %s1995_s9  ;;  %v838_v29 = vrot.slane %v2557_v13, 2 }
  0xb4   : > { %991 = vrot.lane.b32.xlu0 %v959_v15, %s1994_s8  ;;  %v960_v15 = vrot.slane %v2580_v24, 2  ;;  %v964_v24 = vrot.slane %v2584_v30, 3  ;;  %v996_v30 = vrot.slane %v2533_v23, 3 }
  0xb5   : > { %v2613_v43 = vpop.permute.xlu1 %842  ;;  %v839_v32 = vsel %vm797_vm4, %v837_v27, %v838_v29 }
  0xb6   : > { %v2618_v2 = vpop.permute.xlu0 %781  ;;  %v962_v58 = vor.u32 %v961_v19, %v960_v15  ;;  %v1078_v15 = vsel %vm1066_vm7, %v1887_v9, %v2535_v38 }
  0xb7   : > { %543 = vrot.lane.b32.xlu1 %v386_v55, %s1991_s29  ;;  %v963_v55 = vrot.slane %v763_v49, 2  ;;  %v997_v49 = vrot.slane %v2548_v63, 3 }
  0xb8   : > { %569 = vrot.lane.b32.xlu0 %v542_v46, %s1991_s29 }
  0xb9   : > { %v2623_v28 = vpop.permute.xlu1 %846  ;;  %v965_v46 = vor.u32 %v964_v24, %v963_v55  ;;  %v998_v63 = vsel %vm995_vm6, %v996_v30, %v997_v49  ;;  %v1889_v24 = vld [vmem:[%s2106_s23 + $0x48] sm:$0xff]  }
  0xba   : > { %v2626_v36 = vpop.permute.xlu0 %844 }
  0xbb   : > { %614 = vrot.lane.b32.xlu1 %v574_v12, %s1990_s24  ;;  %v966_v10 = vsel %vm868_vm5, %v962_v58, %v965_v46  ;;  %v1035_v12 = vrot.slane %v2538_v39, 3 }
  0xbc   : > { %640 = vrot.lane.b32.xlu0 %v613_v31, %s1990_s24  ;;  %v1885_v31 = vld [vmem:[%s2106_s23 + $0xc] sm:$0xff]  }
  0xbd   : > { %v2639_v16 = vpop.permute.xlu1 %852  ;;  %v1070_v35 = vsel %vm1066_vm7, %v1885_v31, %v2511_v37  ;;  %v1037_v27 = vsel %vm995_vm6, %v1035_v12, %v1036_v22  ;;  %v1072_v37 = vsel %vm1066_vm7, %v1886_v40, %v2524_v47  ;;  %v1107_v47 = vsel %vm1095_vm8, %v1078_v15, %v2562_v18 }
  0xbe   : > { %v851_v56 = vpop.permute.xlu0 %850  ;;  %v1099_v29 = vsel %vm1095_vm8, %v1070_v35, %v2494_v1  ;;  %v1101_v38 = vsel %vm1095_vm8, %v1072_v37, %v2490_v62  ;;  %v1136_v19 = vsel %vm1124_vm9, %v1107_v47, %v2594_v44 }
  0xbf   : > { %769 = vrot.lane.b32.xlu1 %v651_v48, %s1992_s30  ;;  %v1128_v45 = vsel %vm1124_vm9, %v1099_v29, %v2586_v25  ;;  %v1888_v25 = vld [vmem:[%s2106_s23 + $0x24] sm:$0xff]   ;;  %v1165_v18 = vsel %vm1153_vm10, %v1136_v19, %v851_v56 }
  0xc0   : > { %795 = vrot.lane.b32.xlu0 %v768_v54, %s1992_s30  ;;  %v1157_v1 = vsel %vm1153_vm10, %v1128_v45, %v2613_v43  ;;  %v1074_v54 = vsel %vm1066_vm7, %v1888_v25, %v2519_v14  ;;  %v1130_v43 = vsel %vm1124_vm9, %v1101_v38, %v2576_v11  ;;  %v1080_v14 = vsel %vm1066_vm7, %v1889_v24, %v2540_v20 }
  0xc1   : > { %v972_v57 = vpop.permute.xlu1 %971  ;;  %v1159_v62 = vsel %vm1153_vm10, %v1130_v43, %v2626_v36  ;;  %v1109_v44 = vsel %vm1095_vm8, %v1080_v14, %v2553_v8  ;;  %v1103_v41 = vsel %vm1095_vm8, %v1074_v54, %v2507_v4 }
  0xc2   : > { %v970_v51 = vpop.permute.xlu0 %969  ;;  %v1132_v20 = vsel %vm1124_vm9, %v1103_v41, %v2600_v52 }
  0xc3   : > { %840 = vrot.lane.b32.xlu1 %v800_v21, %s1993_s7  ;;  %v1186_v53 = vsel %vm1182_vm11, %v1157_v1, %v970_v51  ;;  %v1188_v21 = vsel %vm1182_vm11, %v1159_v62, %v972_v57  ;;  %v1138_v57 = vsel %vm1124_vm9, %v1109_v44, %v2618_v2  ;;  %v1161_v4 = vsel %vm1153_vm10, %v1132_v20, %v2623_v28 }
  0xc4   : > { %866 = vrot.lane.b32.xlu0 %v839_v32, %s1993_s7  ;;  %v1167_v8 = vsel %vm1153_vm10, %v1138_v57, %v2639_v16 }
  0xc5   : > { %v978_v50 = vpop.permute.xlu1 %977 }
  0xc6   : > { %v974_v26 = vpop.permute.xlu0 %973  ;;  %v1194_v11 = vsel %vm1182_vm11, %v1165_v18, %v978_v50 }
  0xc7   : > { %967 = vrot.lane.b32.xlu1 %v875_v7, %s1994_s8  ;;  %v1190_v58 = vsel %vm1182_vm11, %v1161_v4, %v974_v26 }
  0xc8   : > { %993 = vrot.lane.b32.xlu0 %v966_v10, %s1994_s8 }
  0xc9   : > { %v1041_v42 = vpop.permute.xlu1 %1040 }
  0xca   : > { %v980_v13 = vpop.permute.xlu0 %979  ;;  %v2683_v34 = vsel %vm1211_vm12, %v1186_v53, %v1041_v42 }
  0xcb   : > { %1038 = vrot.lane.b32.xlu1 %v998_v63, %s1995_s9  ;;  %v1196_v52 = vsel %vm1182_vm11, %v1167_v8, %v980_v13 }
  0xcc   : > { %1064 = vrot.lane.b32.xlu0 %v1037_v27, %s1995_s9 }
  0xcd   : > { %v1045_v48 = vpop.permute.xlu1 %1044 }
  0xce   : > { %v1043_v33 = vpop.permute.xlu0 %1042  ;;  %v2727_v2 = vsel %vm1211_vm12, %v1190_v58, %v1045_v48 }
  0xcf   : > { %v2710_v56 = vsel %vm1211_vm12, %v1188_v21, %v1043_v33 }
  0xd0   : > { %1248 = vrot.lane.b32.xlu0 %v2683_v34, %s1996_s10 }
  0xd1   : > { %v1051_v55 = vpop.permute.xlu1 %1050 }
  0xd2   : > { %v1049_v0 = vpop.permute.xlu0 %1048  ;;  %v2730_v51 = vsel %vm1211_vm12, %v1196_v52, %v1051_v55 }
  0xd3   : > { %v2707_v36 = vsel %vm1211_vm12, %v1194_v11, %v1049_v0 }
  0xd4   : > { %1265 = vrot.lane.b32.xlu0 %v2710_v56, %s1997_s11  ;;  %1256 = vrot.lane.b32.xlu1 %v2707_v36, %s1996_s10 }
  0xd5   : > { %v558_v32 = vpop.permute.xlu1 %557 }
  0xd6   : > { %v552_v46 = vpop.permute.xlu0 %551  ;;  %v1082_v7 = vsel %vm1066_vm7, %v2317_v59, %v558_v32 }
  0xd7   : > { %v1076_v31 = vsel %vm1066_vm7, %v2321_v60, %v552_v46 }
  0xd8   : > { %1273 = vrot.lane.b32.xlu0 %v2730_v51, %s1997_s11  ;;  %1282 = vrot.lane.b32.xlu1 %v2727_v2, %s1994_s8 }
  0xd9   : > { %v629_v28 = vpop.permute.xlu1 %628 }
  0xda   : > { %v623_v16 = vpop.permute.xlu0 %622  ;;  %v1111_v49 = vsel %vm1095_vm8, %v1082_v7, %v629_v28 }
  0xdb   : > { %v1105_v63 = vsel %vm1095_vm8, %v1076_v31, %v623_v16 }
  0xdc   : > { %1258 = vrot.lane.b32.xlu0 %v2730_v51, %s1996_s10  ;;  %1250 = vrot.lane.b32.xlu1 %v2710_v56, %s1996_s10 }
  0xdd   : > { %v784_v30 = vpop.permute.xlu1 %783 }
  0xde   : > { %v778_v50 = vpop.permute.xlu0 %777  ;;  %v1140_v10 = vsel %vm1124_vm9, %v1111_v49, %v784_v30 }
  0xdf   : > { %v1134_v27 = vsel %vm1124_vm9, %v1105_v63, %v778_v50 }
  0xe0   : > { %1267 = vrot.lane.b32.xlu1 %v2727_v2, %s1997_s11 }
  0xe1   : > { %v855_v12 = vpop.permute.xlu1 %854 }
  0xe2   : > { %v849_v22 = vpop.permute.xlu0 %848  ;;  %v1169_v26 = vsel %vm1153_vm10, %v1140_v10, %v855_v12 }
  0xe3   : > { %v1163_v13 = vsel %vm1153_vm10, %v1134_v27, %v849_v22 }
  0xe5   : > { %v982_v59 = vpop.permute.xlu1 %981 }
  0xe6   : > { %v976_v35 = vpop.permute.xlu0 %975  ;;  %v1198_v42 = vsel %vm1182_vm11, %v1169_v26, %v982_v59 }
  0xe7   : > { %v1192_v40 = vsel %vm1182_vm11, %v1163_v13, %v976_v35 }
  0xe9   : > { %v1053_v29 = vpop.permute.xlu1 %1052 }
  0xea   : > { %v2755_v37 = vsel %vm1211_vm12, %v1198_v42, %v1053_v29  ;;  %v1047_v9 = vpop.permute.xlu0 %1046 }
  0xeb   : > { %v2758_v15 = vsel %vm1211_vm12, %v1192_v40, %v1047_v9  ;;  %1275 = vrot.lane.b32.xlu1 %v2755_v37, %s1997_s11 }
  0xec   : > { %1284 = vrot.lane.b32.xlu0 %v2758_v15, %s1994_s8 }
  0xed   : > { %v631_v60 = vpop.permute.xlu1 %630 }
  0xee   : > { %v560_v45 = vpop.permute.xlu0 %559 }
  0xef   : > { %v1084_v1 = vsel %vm1066_vm7, %v2388_v3, %v560_v45  ;;  %1260 = vrot.lane.b32.xlu1 %v2755_v37, %s1996_s10 }
  0xf0   : > { %1252 = vrot.lane.b32.xlu0 %v2727_v2, %s1996_s10  ;;  %v1113_v53 = vsel %vm1095_vm8, %v1084_v1, %v631_v60 }
  0xf1   : > { %v857_v48 = vpop.permute.xlu1 %856 }
  0xf2   : > { %v786_v33 = vpop.permute.xlu0 %785 }
  0xf3   : > { %v1142_v47 = vsel %vm1124_vm9, %v1113_v53, %v786_v33  ;;  %1286 = vrot.lane.b32.xlu1 %v2707_v36, %s1994_s8 }
  0xf4   : > { %1269 = vrot.lane.b32.xlu0 %v2758_v15, %s1997_s11  ;;  %v1171_v3 = vsel %vm1153_vm10, %v1142_v47, %v857_v48 }
  0xf5   : > { %v1055_v38 = vpop.permute.xlu1 %1054 }
  0xf6   : > { %v984_v25 = vpop.permute.xlu0 %983 }
  0xf7   : > { %v1200_v54 = vsel %vm1182_vm11, %v1171_v3, %v984_v25  ;;  %1254 = vrot.lane.b32.xlu1 %v2758_v15, %s1996_s10 }
  0xf8   : > { %v2781_v43 = vsel %vm1211_vm12, %v1200_v54, %v1055_v38  ;;  %v1396_v38 = vld [vmem:[%s3009_s1 + $0x4] sm:$0xff] }
  0xf9   : > { %1277 = vrot.lane.b32.xlu0 %v2781_v43, %s1997_s11  ;;  %v633_v19 = vpop.permute.xlu1 %632  ;;  %v1735_v25 = vcombine.high %v1396_v38, %v1396_v38 }
  0xfa   : > { %v562_v62 = vpop.permute.xlu0 %561 }
  0xfb   : > { %v1086_v18 = vsel %vm1066_vm7, %v2411_v61, %v562_v62  ;;  %1271 = vrot.lane.b32.xlu1 %v2707_v36, %s1997_s11  ;;  %v1734_v62 = vcombine.low %v1396_v38, %v1396_v38 }
  0xfc   : > { %v1115_v24 = vsel %vm1095_vm8, %v1086_v18, %v633_v19 }
  0xfd   : > { %1262 = vrot.lane.b32.xlu0 %v2781_v43, %s1996_s10  ;;  %v859_v55 = vpop.permute.xlu1 %858 }
  0xfe   : > { %v788_v14 = vpop.permute.xlu0 %787 }
  0xff   : > { %v1144_v21 = vsel %vm1124_vm9, %v1115_v24, %v788_v14 }
 0x100   : > { %v1173_v0 = vsel %vm1153_vm10, %v1144_v21, %v859_v55  ;;  %v2854_v55 = vld [vmem:[%s3009_s1] sm:$0xff] }
 0x101   : > { %1288 = vrot.lane.b32.xlu0 %v2730_v51, %s1994_s8  ;;  %v1057_v11 = vpop.permute.xlu1 %1056  ;;  %v1747_v14 = vcombine.high %v2854_v55, %v2854_v55 }
 0x102   : > { %v986_v44 = vpop.permute.xlu0 %985 }
 0x103   : > { %v1202_v61 = vsel %vm1182_vm11, %v1173_v0, %v986_v44  ;;  %1756 = vmatprep.mubr.msk.bf16.mxu0 %vm1481_vm13, %v1747_v14 }
 0x104   : > { %v2798_v41 = vsel %vm1211_vm12, %v1202_v61, %v1057_v11 }
 0x105   : > { %1290 = vrot.lane.b32.xlu0 %v2755_v37, %s1994_s8  ;;  %1279 = vrot.lane.b32.xlu1 %v2798_v41, %s1997_s11  ;;  %v635_v20 = vpop.permute.xlu1 %634 }
 0x106   : > { %v564_v57 = vpop.permute.xlu0 %563 }
 0x107   : > { %v1088_v4 = vsel %vm1066_vm7, %v2437_v6, %v564_v57 }
 0x108   : > { %v1117_v32 = vsel %vm1095_vm8, %v1088_v4, %v635_v20 }
 0x109   : > { %1359 = vrot.lane.b32.xlu1 %v2798_v41, %s1996_s10  ;;  %v861_v8 = vpop.permute.xlu1 %860 }
 0x10a   : > { %v790_v58 = vpop.permute.xlu0 %789 }
 0x10b   : > { %v1146_v52 = vsel %vm1124_vm9, %v1117_v32, %v790_v58 }
 0x10c   : > { %v1175_v28 = vsel %vm1153_vm10, %v1146_v52, %v861_v8 }
 0x10d   : > { %1292 = vrot.lane.b32.xlu1 %v2781_v43, %s1994_s8  ;;  %v1059_v46 = vpop.permute.xlu1 %1058 }
 0x10e   : > { %v988_v16 = vpop.permute.xlu0 %987 }
 0x10f   : > { %v1204_v7 = vsel %vm1182_vm11, %v1175_v28, %v988_v16 }
 0x110   : > { %v2815_v6 = vsel %vm1211_vm12, %v1204_v7, %v1059_v46  ;;  %v1882_v46 = vld [vmem:[%s3009_s1 + $0xc] ss:$0 sps:$4 sm:$0xff]  }
 0x111   : > { %1368 = vrot.lane.b32.xlu0 %v2815_v6, %s1997_s11  ;;  %v637_v30 = vpop.permute.xlu1 %636 }
 0x112   : > { %v566_v49 = vpop.permute.xlu0 %565 }
 0x113   : > { %v1090_v50 = vsel %vm1066_vm7, %v2465_v5, %v566_v49 }
 0x114   : > { %v1119_v12 = vsel %vm1095_vm8, %v1090_v50, %v637_v30 }
 0x115   : > { %1361 = vrot.lane.b32.xlu0 %v2815_v6, %s1996_s10  ;;  %v863_v10 = vpop.permute.xlu1 %862 }
 0x116   : > { %v792_v22 = vpop.permute.xlu0 %791 }
 0x117   : > { %v1148_v26 = vsel %vm1124_vm9, %v1119_v12, %v792_v22 }
 0x118   : > { %v1177_v31 = vsel %vm1153_vm10, %v1148_v26, %v863_v10 }
 0x119   : > { %1294 = vrot.lane.b32.xlu0 %v2798_v41, %s1994_s8  ;;  %v1061_v59 = vpop.permute.xlu1 %1060 }
 0x11a   : > { %v990_v35 = vpop.permute.xlu0 %989 }
 0x11b   : > { %v1206_v63 = vsel %vm1182_vm11, %v1177_v31, %v990_v35 }
 0x11c   : > { %v2830_v5 = vsel %vm1211_vm12, %v1206_v63, %v1061_v59 }
 0x11d   : > { %1370 = vrot.lane.b32.xlu1 %v2830_v5, %s1997_s11  ;;  %v639_v42 = vpop.permute.xlu1 %638 }
 0x11e   : > { %v568_v27 = vpop.permute.xlu0 %567 }
 0x11f   : > { %v1092_v13 = vsel %vm1066_vm7, %v2497_v17, %v568_v27 }
 0x120   : > { %v1121_v40 = vsel %vm1095_vm8, %v1092_v13, %v639_v42 }
 0x121   : > { %1363 = vrot.lane.b32.xlu1 %v2830_v5, %s1996_s10  ;;  %v865_v29 = vpop.permute.xlu1 %864 }
 0x122   : > { %v794_v9 = vpop.permute.xlu0 %793 }
 0x123   : > { %v1150_v60 = vsel %vm1124_vm9, %v1121_v40, %v794_v9 }
 0x124   : > { %v1179_v1 = vsel %vm1153_vm10, %v1150_v60, %v865_v29 }
 0x125   : > { %1296 = vrot.lane.b32.xlu1 %v2815_v6, %s1994_s8  ;;  %v1063_v45 = vpop.permute.xlu1 %1062 }
 0x126   : > { %v992_v48 = vpop.permute.xlu0 %991 }
 0x127   : > { %v1208_v53 = vsel %vm1182_vm11, %v1179_v1, %v992_v48 }
 0x128   : > { %v1237_v17 = vsel %vm1211_vm12, %v1208_v53, %v1063_v45 }
 0x129   : > { %1372 = vrot.lane.b32.xlu0 %v1237_v17, %s1997_s11  ;;  %v544_v33 = vpop.permute.xlu1 %543 }
 0x12a   : > { %v570_v47 = vpop.permute.xlu0 %569  ;;  %v1068_v11 = vsel %vm1066_vm7, %v2533_v23, %v544_v33 }
 0x12b   : > { %v1094_v0 = vsel %vm1066_vm7, %v2538_v39, %v570_v47 }
 0x12d   : > { %1365 = vrot.lane.b32.xlu0 %v1237_v17, %s1996_s10  ;;  %v615_v3 = vpop.permute.xlu1 %614 }
 0x12e   : > { %v641_v54 = vpop.permute.xlu0 %640  ;;  %v1097_v57 = vsel %vm1095_vm8, %v1068_v11, %v615_v3 }
 0x12f   : > { %v1123_v20 = vsel %vm1095_vm8, %v1094_v0, %v641_v54 }
 0x131   : > { %v770_v19 = vpop.permute.xlu1 %769  ;;  %1408 = vrot.lane.b32.xlu0 %v1735_v25, %s1993_s7 }
 0x132   : > { %v796_v18 = vpop.permute.xlu0 %795  ;;  %v1126_v52 = vsel %vm1124_vm9, %v1097_v57, %v770_v19 }
 0x133   : > { %v1152_v4 = vsel %vm1124_vm9, %v1123_v20, %v796_v18 }
 0x135   : > { %v841_v24 = vpop.permute.xlu1 %840  ;;  %1406 = vrot.lane.b32.xlu0 %v1734_v62, %s1993_s7 }
 0x136   : > { %v867_v21 = vpop.permute.xlu0 %866  ;;  %v1155_v28 = vsel %vm1153_vm10, %v1126_v52, %v841_v24 }
 0x137   : > { %v1181_v8 = vsel %vm1153_vm10, %v1152_v4, %v867_v21 }
 0x139   : > { %v968_v61 = vpop.permute.xlu1 %967 }
 0x13a   : > { %v994_v44 = vpop.permute.xlu0 %993  ;;  %v1184_v7 = vsel %vm1182_vm11, %v1155_v28, %v968_v61 }
 0x13b   : > { %v1210_v32 = vsel %vm1182_vm11, %v1181_v8, %v994_v44 }
 0x13d   : > { %v1039_v39 = vpop.permute.xlu1 %1038 }
 0x13e   : > { %v1065_v58 = vpop.permute.xlu0 %1064  ;;  %v1213_v50 = vsel %vm1211_vm12, %v1184_v7, %v1039_v39  ;;  %v1746_v7 = vcombine.low %v2854_v55, %v2854_v55 }
 0x13f   : > { %v1239_v23 = vsel %vm1211_vm12, %v1210_v32, %v1065_v58 }
 0x140   : > { %1374 = vrot.lane.b32.xlu1 %v1239_v23, %s1997_s11 }
 0x142   : > { %v1249_v16 = vpop.permute.xlu0 %1248 }
 0x143   : > { %v1300_v26 = vsel %vm1298_vm14, %v1213_v50, %v1249_v16 }
 0x144   : > { %1410 = vrot.lane.b32.xlu1 %v1882_v46, %s1993_s7  ;;  %s1757_s7 = sshll.u32 %s1971_s18, 7 }
 0x145   : > { %s1555_s8 = sshra.s32 %s1757_s7, 7 }
 0x146   : > { %v1266_v30 = vpop.permute.xlu0 %1265  ;;  %v1257_v49 = vpop.permute.xlu1 %1256  ;;  %s1758_s9 = sshll.u32 %s1555_s8, 2 }
 0x147   : > { %v1308_v10 = vsel %vm1298_vm14, %v2758_v15, %v1257_v49  ;;  %v1317_v35 = vsel %vm1315_vm15, %v1300_v26, %v1266_v30  ;;  %s1558_s10 = scalar_lea.vmem %s2102_s13, %s1758_s9 [#allocation4] }
 0x14a   : > { %v1274_v12 = vpop.permute.xlu0 %1273  ;;  %v1283_v22 = vpop.permute.xlu1 %1282 }
 0x14b   : > { %1737 = vmatprep.subr.msk.bf16.mxu1 %vm1182_vm11, %v1274_v12  ;;  %v1329_v59 = vsel %vm1315_vm15, %v1308_v10, %v1274_v12  ;;  %v1341_v31 = vsel %vm1182_vm11, %v1266_v30, %v1283_v22 }
 0x14c   : > { %1436 = vmatpush1.bf16.xpose.msra.mxu1 %v1329_v59  ;;  %1748 = vmatprep.subr.msk.bf16.mxu0 %vm1481_vm13, %v1341_v31 }
 0x14d   : > { %1502 = vmatpush1.bf16.xpose.msra.mxu0 %v1317_v35 }
 0x14e   : > { %v1251_v63 = vpop.permute.xlu1 %1250  ;;  %v1259_v27 = vpop.permute.xlu0 %1258 }
 0x14f   : > { %v1310_v15 = vsel %vm1298_vm14, %v2707_v36, %v1259_v27  ;;  %v1302_v9 = vsel %vm1298_vm14, %v2683_v34, %v1251_v63 }
 0x152   : > { %v1268_v42 = vpop.permute.xlu1 %1267 }
 0x153   : > { %v1320_v45 = vsel %vm1315_vm15, %v1302_v9, %v1268_v42  ;;  %v1541_v9 = vld [vmem:[#allocation2] sm:$0xff] }
 0x15d   : > { %v1276_v13 = vpop.permute.xlu1 %1275 }
 0x15e   : > { %v1285_v29 = vpop.permute.xlu0 %1284  ;;  %1738 = vmatprep.subr.msk.bf16.mxu1 %vm1182_vm11, %v1276_v13  ;;  %v1332_v40 = vsel %vm1315_vm15, %v1310_v15, %v1276_v13 }
 0x15f   : > { %v1343_v60 = vsel %vm1182_vm11, %v1268_v42, %v1285_v29  ;;  %1438 = vmatpush1.bf16.xpose.msra.mxu1 %v1332_v40 }
 0x160   : > { %1749 = vmatprep.subr.msk.bf16.mxu0 %vm1481_vm13, %v1343_v60 }
 0x161   : > { %1504 = vmatpush1.bf16.xpose.msra.mxu0 %v1320_v45  ;;  %v1261_v1 = vpop.permute.xlu1 %1260  ;;  %v1547_v45 = vld [vmem:[#allocation3] sm:$0xff] }
 0x162   : > { %v1253_v48 = vpop.permute.xlu0 %1252  ;;  %v1312_v34 = vsel %vm1298_vm14, %v2730_v51, %v1261_v1 }
 0x163   : > { %v1304_v53 = vsel %vm1298_vm14, %v2710_v56, %v1253_v48 }
 0x165   : > { %v1287_v36 = vpop.permute.xlu1 %1286 }
 0x166   : > { %v1270_v17 = vpop.permute.xlu0 %1269 }
 0x167   : > { %v1345_v33 = vsel %vm1182_vm11, %v1270_v17, %v1287_v36  ;;  %v1323_v47 = vsel %vm1315_vm15, %v1304_v53, %v1270_v17 }
 0x168   : > { %1750 = vmatprep.subr.msk.bf16.mxu0 %vm1481_vm13, %v1345_v33  ;;  %v1998_v33 = vmov (!%p1759_p0), 0  }
 0x169   : > { %1506 = vmatpush1.bf16.xpose.msra.mxu0 %v1323_v47  ;;  %v1255_v3 = vpop.permute.xlu1 %1254  ;;  %1890 = vset.pattern.permute.xlu0 (!%p1759_p0), %v1998_v33 }
 0x16a   : > { %v1306_v62 = vsel %vm1298_vm14, %v2727_v2, %v1255_v3 }
 0x16b   : > { %v1278_v38 = vpop.permute.xlu0 %1277 }
 0x16c   : > { %1739 = vmatprep.subr.msk.bf16.mxu1 %vm1182_vm11, %v1278_v38  ;;  %v1335_v25 = vsel %vm1315_vm15, %v1312_v34, %v1278_v38 }
 0x16d   : > { %1440 = vmatpush1.bf16.xpose.msra.mxu1 %v1335_v25  ;;  %v1272_v56 = vpop.permute.xlu1 %1271 }
 0x16e   : > { %v1326_v24 = vsel %vm1315_vm15, %v1306_v62, %v1272_v56 }
 0x16f   : > { %v1263_v54 = vpop.permute.xlu0 %1262 }
 0x170   : > { %v1314_v51 = vsel %vm1298_vm14, %v2755_v37, %v1263_v54 }
 0x173   : > { %v1289_v19 = vpop.permute.xlu0 %1288 }
 0x174   : > { %v1347_v18 = vsel %vm1182_vm11, %v1272_v56, %v1289_v19  ;;  %v1573_v56 = vld [vmem:[%s3010_s2] sm:$0xff] (!%p1759_p0) }
 0x175   : > { %1751 = vmatprep.subr.msk.bf16.mxu0 %vm1481_vm13, %v1347_v18  ;;  %v1575_v18 = vld [vmem:[%s3011_s3] sm:$0xff] (!%p1759_p0) }
 0x176   : > { %1508 = vmatpush1.bf16.xpose.msra.mxu0 %v1326_v24 }
 0x177   : > { %v1291_v14 = vpop.permute.xlu0 %1290  ;;  %v1280_v21 = vpop.permute.xlu1 %1279 }
 0x178   : > { %v1349_v11 = vsel %vm1182_vm11, %v1274_v12, %v1291_v14  ;;  %1740 = vmatprep.subr.msk.bf16.mxu1 %vm1182_vm11, %v1280_v21  ;;  %v1338_v0 = vsel %vm1315_vm15, %v1314_v51, %v1280_v21 }
 0x179   : > { %1442 = vmatpush1.bf16.xpose.msra.mxu1 %v1338_v0  ;;  %1752 = vmatprep.subr.msk.bf16.mxu0 %vm1481_vm13, %v1349_v11 }
 0x17b   : > { %v1360_v2 = vpop.permute.xlu1 %1359 }
 0x17c   : > { %v1377_v37 = vsel %vm1298_vm14, %v2781_v43, %v1360_v2 }
 0x17e   : > { %1510 = vmatpush1.bf16.xpose.msra.mxu0 %v1329_v59 }
 0x17f   : > { %v1293_v44 = vpop.permute.xlu1 %1292 }
 0x180   : > { %v1351_v61 = vsel %vm1182_vm11, %v1276_v13, %v1293_v44 }
 0x181   : > { %1753 = vmatprep.subr.msk.bf16.mxu0 %vm1481_vm13, %v1351_v61 }
 0x183   : > { %v1369_v20 = vpop.permute.xlu0 %1368 }
 0x184   : > { %1741 = vmatprep.subr.msk.bf16.mxu1 %vm1182_vm11, %v1369_v20  ;;  %v1385_v57 = vsel %vm1315_vm15, %v1377_v37, %v1369_v20 }
 0x185   : > { %1444 = vmatpush1.bf16.xpose.msra.mxu1 %v1385_v57 }
 0x186   : > { %1512 = vmatpush1.bf16.xpose.msra.mxu0 %v1332_v40 }
 0x187   : > { %v1362_v4 = vpop.permute.xlu0 %1361 }
 0x188   : > { %v1379_v58 = vsel %vm1298_vm14, %v2798_v41, %v1362_v4 }
 0x18b   : > { %v1295_v8 = vpop.permute.xlu0 %1294 }
 0x18c   : > { %v1353_v32 = vsel %vm1182_vm11, %v1278_v38, %v1295_v8 }
 0x18d   : > { %1754 = vmatprep.subr.msk.bf16.mxu0 %vm1481_vm13, %v1353_v32 }
 0x18e   : > { %1514 = vmatpush1.bf16.xpose.msra.mxu0 %v1335_v25 }
 0x18f   : > { %v1371_v52 = vpop.permute.xlu1 %1370 }
 0x190   : > { %1742 = vmatprep.subr.msk.bf16.mxu1 %vm1182_vm11, %v1371_v52  ;;  %v1388_v43 = vsel %vm1315_vm15, %v1379_v58, %v1371_v52 }
 0x191   : > { %1446 = vmatpush1.bf16.xpose.msra.mxu1 %v1388_v43 }
 0x193   : > { %v1364_v23 = vpop.permute.xlu1 %1363 }
 0x194   : > { %v1381_v28 = vsel %vm1298_vm14, %v2815_v6, %v1364_v23 }
 0x197   : > { %v1297_v39 = vpop.permute.xlu1 %1296 }
 0x198   : > { %v1355_v46 = vsel %vm1182_vm11, %v1280_v21, %v1297_v39 }
 0x199   : > { %1755 = vmatprep.subr.msk.bf16.mxu0 %vm1481_vm13, %v1355_v46 }
 0x19a   : > { %1516 = vmatpush1.bf16.xpose.msra.mxu0 %v1338_v0 }
 0x19b   : > { %v1373_v16 = vpop.permute.xlu0 %1372 }
 0x19c   : > { %1743 = vmatprep.subr.msk.bf16.mxu1 %vm1182_vm11, %v1373_v16  ;;  %v1391_v41 = vsel %vm1315_vm15, %v1381_v28, %v1373_v16 }
 0x19d   : > { %1448 = vmatpush1.bf16.xpose.msra.mxu1 %v1391_v41 }
 0x19f   : > { %v1366_v30 = vpop.permute.xlu0 %1365 }
 0x1a0   : > { %v1383_v50 = vsel %vm1298_vm14, %v2830_v5, %v1366_v30 }
 0x1a1   : > { %1534 = vmatmul.mubr.bf16.vlgmr.msra.gmra.mrb[0].mxu0 %v1746_v7 }
 0x1a3   : > { %v1409_v49 = vpop.permute.xlu0 %1408 }
 0x1a7   : > { %v1407_v22 = vpop.permute.xlu0 %1406 }
 0x1a8   : > { %v1413_v55 = vsel %vm1153_vm10, %v1407_v22, %v1409_v49 }
 0x1b2   : > { %v1375_v10 = vpop.permute.xlu1 %1374 }
 0x1b3   : > { %1744 = vmatprep.subr.msk.bf16.mxu1 %vm1182_vm11, %v1375_v10  ;;  %v1394_v6 = vsel %vm1315_vm15, %v1383_v50, %v1375_v10 }
 0x1b4   : > { %1450 = vmatpush1.bf16.xpose.msra.mxu1 %v1394_v6 }
 0x1b6   : > { %v1411_v12 = vpop.permute.xlu1 %1410 }
 0x1b7   : > { %v1414_v26 = vsel %vm1153_vm10, %v1409_v49, %v1411_v12 }
 0x1b8   : > { %1745 = vmatprep.mubr.msk.bf16.mxu1 %vm1182_vm11, %v1414_v26 }
 0x1bb   : > { %1468 = vmatmul.mubr.bf16.vlgmr.msra.gmra.mrb[0].mxu1 %v1413_v55 }
 0x274   : > { %v1535_v59 = vpop.f32.mrb[0].mxu0 }
 0x275   : > { %v1537_v31 = vpop.f32.mrb[1].mxu0 }
 0x276   : > { %v1538_v35 = vpop.f32.mrb[2].mxu0 }
 0x277   : > { %v1539_v5 = vpop.f32.mrb[3].mxu0 }
 0x28e   : > { %v1469_v63 = vpop.f32.mrb[0].mxu1 }
 0x28f   : > { %v1536_v42 = vadd.f32 %v1535_v59, %v1469_v63  ;;  %v1471_v27 = vpop.f32.mrb[1].mxu1 }
 0x290   : > { %v1472_v15 = vpop.f32.mrb[2].mxu1 }
 0x291   : > { %v1554_v13 = vpack.c.bf16 %v1536_v42, %v1536_v42  ;;  %1542 = vadd.xlane.f32.xlu1 %v1536_v42  ;;  %v1473_v29 = vpop.f32.mrb[3].mxu1  ;;  %v1548_v40 = vmul.f32 %v1536_v42, %v1536_v42 }
 0x293   : > { %1559 = vst [vmem:[%s1558_s10] sm:$0xf] %v1554_v13  ;;  %1549 = vadd.xlane.f32.xlu0 %v1548_v40 }
 0x29a   : > { %v1578_v14 = vld [vmem:[%s2102_s13] sm:$0xff] (!%p1759_p0) }
 0x29b   : > { %v1579_v21 = vunpack.c.l.bf16 (!%p1759_p0), %v1578_v14  ;;  %v1580_v11 = vunpack.c.h.bf16 (!%p1759_p0), %v1578_v14 }
 0x31d   : > { %1563 = sbr.rel (%p1759_p0) target bundleno = 971 (0x3cb), region = 44 }
 0x31e   : > { %v1543_v60 = vpop.xlane.xlu1 %1542 }
 0x31f   : > { %v1544_v1 = vadd.f32 %v1543_v60, %v1541_v9 }
 0x320   : > { %v1550_v48 = vpop.xlane.xlu0 %1549 }
 0x321   : > { %1546 = vst.msk [vmem:[#allocation2] sm:$0xff] %vm1545_vm0, %v1544_v1  ;;  %v1551_v36 = vadd.f32 %v1550_v48, %v1547_v45 }
 0x323   : > { %1552 = vst.msk [vmem:[#allocation3] sm:$0xff] %vm1545_vm0, %v1551_v36 }
 0x328   : > { %v1564_v53 = vld [vmem:[#allocation2] sm:$0xff] }
 0x329   : > { %v1565_v47 = vmul.f32 0.00390625, %v1564_v53 }
 0x32a   : > { %v1566_v17 = vld [vmem:[#allocation3] sm:$0xff] }
 0x32b   : > { %v1567_v34 = vmul.f32 0.00390625, %v1566_v17  ;;  %v1568_v38 = vmul.f32 %v1565_v47, %v1565_v47 }
 0x32d   : > { %v1569_v3 = vsub.f32 %v1567_v34, %v1568_v38 }
 0x32f   : > { %v1570_v25 = vmax.f32 %v1569_v3, 0.0 }
 0x331   : > { %v1571_v54 = vadd.f32 1e-05, %v1570_v25 }
 0x333   : > { %1891 = vrsqrt.f32 %v1571_v54 }
 0x33d   : > { %v1892_v19 = vpop.eup %1891 }
 0x33e   : > { %v1574_v62 = vmul.f32 %v1892_v19, %v1573_v56 }
 0x340   : > { %1583 = vperm.xlu0 %1890, %v1574_v62   ;;  %v1576_v24 = vmul.f32 %v1574_v62, %v1565_v47 }
 0x342   : > { %v1577_v51 = vsub.f32 %v1575_v18, %v1576_v24 }
 0x344   : > { %1590 = vperm.xlu0 %1890, %v1577_v51  }
 0x3bf   : > { %v1584_v0 = vpop.permute.xlu0 %1583 }
 0x3c0   : > { %v1586_v2 = vmul.f32 %v1584_v0, %v1579_v21  ;;  %v1587_v44 = vmul.f32 %v1584_v0, %v1580_v11 }
 0x3c3   : > { %v1591_v61 = vpop.permute.xlu0 %1590 }
 0x3c4   : > { %v1593_v37 = vadd.f32 %v1591_v61, %v1586_v2  ;;  %v1594_v20 = vadd.f32 %v1591_v61, %v1587_v44 }
 0x3c6   : > { %v1595_v57 = vmax.f32 %v1593_v37, 0.0  ;;  %v1596_v4 = vmax.f32 %v1594_v20, 0.0 }
 0x3c8   : > { %v1767_v8 = vpack.c.bf16 %v1596_v4, %v1595_v57 }
 0x3ca   : > { %1605 = vst [vmem:[%s2102_s13] sm:$0xff] %v1767_v8 }
 0x3cb PF: > { %s1768_s23 = sshll.u32 %s1975_s19, 7  ;;  %s1621_s7 = sshll.u32 %s2102_s13, 4  ;;  %s1622_s7 = int_to_ptr.vmem [resolvable:$true] %s1621_s7 }
 0x3cc   : > { %s2958_s30 = scalar_lea.hbm %s3012_s4, %s1768_s23  ;;  %s1607_s8 = scalar_lea.sflag [#allocation5], %s200_s6 }
 0x3cd   : > { %s1893_s9 = scalar_lea.vmem %s1622_s7, 128  ;;  %s1999_s10 = smov [#allocation4]  }
 0x3ce   : > { %p1894_p1 = scmp.ne.s32.totalorder %s1622_s7, %s1893_s9  ;;  %s1897_s11 = sshll.u32 %s1999_s10, 4  ;;  %s1898_s11 = int_to_ptr.vmem [resolvable:$false] %s1897_s11 }
 0x3cf   : > { %s1899_s12 = scalar_lea.vmem %s1898_s11, 256  ;;  %p1900_p5 = scmp.lt.s32.totalorder %s1622_s7, %s1898_s11 }
 0x3d0   : > { %p1895_p2 = pnand %p1894_p1, %p2074_p3  ;;  %p1901_p6 = scmp.lt.s32.totalorder %s1899_s12, %s1893_s9 }
 0x3d2   : > { %p1896_p4 = pneg %p1895_p2  ;;  %p1902_p7 = por %p1901_p6, %p1900_p5 }
 0x3d4   : > { %p1903_p8 = pnand %p1902_p7, %p1896_p4 }
 0x3d6   : > { %1906 = shalt.err (!%p1903_p8)
}
 0x3d7   : > { %s1907_s19 = scalar_lea.hbm %s2958_s30, 128  ;;  %s1911_s18 = scalar_lea.hbm %s3012_s4, 256 }
 0x3d8   : > { %p1908_p10 = scmp.ne.s32.totalorder %s2958_s30, %s1907_s19  ;;  %p1912_p13 = scmp.lt.u32.totalorder %s2958_s30, %s3012_s4 }
 0x3d9   : > { %p1913_p0 = scmp.lt.u32.totalorder %s1911_s18, %s1907_s19  ;;  %p1915_p2 = scmp.lt.u32.totalorder %s1907_s19, %s2958_s30 }
 0x3da   : > { %p1909_p11 = pnand %p1908_p10, %p2074_p3 }
 0x3db   : > { %p1914_p1 = por %p1913_p0, %p1912_p13 }
 0x3dc   : > { %p1910_p12 = pneg %p1909_p11 }
 0x3dd   : > { %p1916_p4 = por %p1915_p2, %p1914_p1 }
 0x3df   : > { %p1917_p5 = pnand %p1916_p4, %p1910_p12 }
 0x3e1   : > { %1920 = shalt.err (!%p1917_p5)
}
 0x3e2   : > { %1771 = dma.vmem_to_hbm [thread:$0]  (%p2074_p3), %s1622_s7, 128, %s2958_s30, %s1607_s8  }
 0x3e3 PF: > { %p1777_p6 = scmp.ge.s32.totalorder %s1987_s22, 2  ;;  %s1633_s24 = sand.u32 1, %s1959_s15  }
 0x3e4   : > { %s1634_s29 = scalar_lea.sflag [#allocation5], %s1633_s24 }
 0x3e5   : > { %p1774_p7 = pnand %p1777_p6, %p2084_p9 }
 0x3e7   : > { %1954 = dma.done.wait (!%p1774_p7), %s1634_s29, 128  }
 0x3e8   : > { %1956 = vsyncadd (!%p1774_p7), %s1634_s29, 4294967168  ;;  %s17_s22 = sadd.s32 1, %s1987_s22   ;;  %s3015_s15 = smov %s1963_s16 }
 0x3e9   : > { %p14_p8 = scmp.ge.s32.totalorder %s17_s22, 6   ;;  %s3016_s16 = smov %s1967_s17 }
 0x3ea   : > { %s3017_s17 = smov %s2092_s5  ;;  %s3018_s18 = smov %s1979_s20 }
 0x3eb   : > { %s3019_s19 = smov %s1983_s21  ;;  %s3020_s20 = smov %s3023_s25 }
 0x3ec   : > { %s3021_s21 = smov %s3027_s26  ;;  %16 = sbr.rel (!%p14_p8) target bundleno = 5 (0x5), region = 81 }
 0x3f3   :  { %1639 = vsyncpa [#allocation5], 1 }
 0x3f4   :  { %1641 = vsyncpa [#allocation5 + $0x1], 1 }

</bundles_post_ra>
